<compile_context>
chip_gen: v5e
topology: v5e:2x2
jax: 0.10.0
libtpu: 0.0.40
codegen_flags: <defaults>
</compile_context>

<pallas_src>
import functools

import jax
import jax.numpy as jnp
import numpy as np
from jax.experimental import pallas as pl
from jax.experimental.pallas import tpu as pltpu


# ----------------------------- small numerics helpers -----------------------------
def _softmax(x, approx=False):
    m = jnp.max(x, axis=-1, keepdims=True)
    e = jnp.exp(x - m)
    return e * pl.reciprocal(jnp.sum(e, axis=-1, keepdims=True), approx=approx)


def _log_softmax(x):
    m = jnp.max(x, axis=-1, keepdims=True)
    s = x - m
    return s - jnp.log(jnp.sum(jnp.exp(s), axis=-1, keepdims=True))


# ----------------------------- the Pallas kernel -----------------------------------
def maml_task_kernel(lrs_ref, imp_ref,                      # SMEM scalar-prefetch
                     xs_ref, ys_ref, xt_ref, yt_ref,        # VMEM inputs (B tasks)
                     wt_ref, b0_ref,                        # VMEM meta-params (c,d)/(1,c)
                     loss_ref, preds_ref,                   # VMEM outputs
                     *, num_steps):
    B, ns, d = xs_ref.shape
    nt = xt_ref.shape[1]
    c = wt_ref.shape[0]
    inv_ns = jnp.float32(1.0 / ns)
    inv_nt = jnp.float32(1.0 / nt)

    xs = xs_ref[...]                                   # (B, ns, d)
    xt = xt_ref[...]                                   # (B, nt, d)

    # Loop-invariant soft-target softmaxes (hoisted out of the step loop; exact).
    p_ys = _softmax(ys_ref[...])                       # (B, ns, c)
    p_yt = _softmax(yt_ref[...])                       # (B, nt, c)

    # Fresh per-task copies of the meta-parameters (names_weights_copy),
    # kept in the transposed, lane-dense (c, d) layout.
    w = jnp.broadcast_to(wt_ref[...][None, :, :], (B, c, d))   # (B, c, d)
    b = jnp.broadcast_to(b0_ref[...], (B, c))                  # (B, c)

    loss_acc = jnp.zeros((B, 1), dtype=jnp.float32)

    # num_steps is small & static -> unrolled inner loop.
    for step in range(num_steps):
        # ---- support forward + analytic grads of the soft-label cross entropy ----
        logits_s = jnp.einsum('bnd,bcd->bnc', xs, w,
                              preferred_element_type=jnp.float32) + b[:, None, :]
        g = (_softmax(logits_s, approx=True) - p_ys) * inv_ns        # dL/dlogits
        gw = jnp.einsum('bnc,bnd->bcd', g, xs,
                        preferred_element_type=jnp.float32)          # dL/dW^T
        gb = jnp.sum(g, axis=1)                                      # dL/db  (B, c)

        # ---- LSLR inner-loop SGD update (apply_inner_loop_update) ----
        lr = lrs_ref[step]
        w = w - lr * gw
        b = b - lr * gb

        # ---- target forward with the updated fast weights ----
        logits_t = jnp.einsum('bnd,bcd->bnc', xt, w,
                              preferred_element_type=jnp.float32) + b[:, None, :]
        per_ex = jnp.sum(_log_softmax(logits_t) * p_yt, axis=-1)     # (B, nt)
        tloss = -jnp.sum(per_ex, axis=-1, keepdims=True) * inv_nt    # (B, 1)

        # multi-step loss (per_step_loss_importance_vectors weighting)
        loss_acc = loss_acc + imp_ref[step] * tloss

        if step == num_steps - 1:
            preds_ref[...] = logits_t.astype(preds_ref.dtype)

    loss_ref[...] = loss_acc[:, :, None]


# ----------------------------- wrapper ---------------------------------------------
def maml_forward(x_support, y_support, x_target, y_target, w0, b0, lrs, imp,
                 task_block=4):
    """Pallas implementation of MAMLFewShotClassifier.forward (training phase,
    use_multi_step_loss_optimization=True, epoch < multi_step_loss_num_epochs)."""
    t, ns, d = x_support.shape
    nt = x_target.shape[1]
    c = y_support.shape[2]
    num_steps = int(lrs.shape[0])

    # Batch B tasks per grid step; pad the task axis if needed.
    B = max(1, min(int(task_block), t))
    t_pad = ((t + B - 1) // B) * B
    if t_pad != t:
        padw = ((0, t_pad - t), (0, 0), (0, 0))
        xs_p = jnp.pad(x_support, padw)
        ys_p = jnp.pad(y_support, padw)
        xt_p = jnp.pad(x_target, padw)
        yt_p = jnp.pad(y_target, padw)
    else:
        xs_p, ys_p, xt_p, yt_p = x_support, y_support, x_target, y_target
    num_blocks = t_pad // B

    # Transposed, lane-dense weight layout (n_classes, D).
    wt = jnp.transpose(w0)

    kernel = functools.partial(maml_task_kernel, num_steps=num_steps)

    grid_spec = pltpu.PrefetchScalarGridSpec(
        num_scalar_prefetch=2,
        grid=(num_blocks,),
        in_specs=[
            pl.BlockSpec((B, ns, d), lambda i, *_: (i, 0, 0)),
            pl.BlockSpec((B, ns, c), lambda i, *_: (i, 0, 0)),
            pl.BlockSpec((B, nt, d), lambda i, *_: (i, 0, 0)),
            pl.BlockSpec((B, nt, c), lambda i, *_: (i, 0, 0)),
            pl.BlockSpec((c, d), lambda i, *_: (0, 0)),
            pl.BlockSpec((1, c), lambda i, *_: (0, 0)),
        ],
        out_specs=[
            pl.BlockSpec((B, 1, 1), lambda i, *_: (i, 0, 0)),
            pl.BlockSpec((B, nt, c), lambda i, *_: (i, 0, 0)),
        ],
    )

    # TODO(synk): for realistic image sizes (large D) the (n, D) input blocks and
    # the (c, D) weight block should be tiled over D (accumulating logits) and
    # vmem_limit_bytes set explicitly for v7x's 64 MiB VMEM; at these toy shapes
    # the whole task batch fits comfortably.
    task_losses, target_preds = pl.pallas_call(
        kernel,
        out_shape=(
            jax.ShapeDtypeStruct((t_pad, 1, 1), jnp.float32),
            jax.ShapeDtypeStruct((t_pad, nt, c), jnp.float32),
        ),
        grid_spec=grid_spec,
        compiler_params=pltpu.CompilerParams(
            dimension_semantics=("parallel",)),   # tasks are independent
    )(lrs, imp, xs_p, ys_p, xt_p, yt_p, wt, b0)

    task_losses = task_losses[:t, 0, 0]
    target_preds = target_preds[:t]

    # get_across_task_loss_metrics + accuracy (cheap glue, done in plain JAX)
    predicted = jnp.argmax(target_preds, axis=-1)
    y_hard = jnp.argmax(y_target, axis=-1)
    accuracy = jnp.mean((predicted == y_hard).astype(jnp.float32))

    losses = {
        "loss": jnp.mean(task_losses),
        "accuracy": accuracy,
    }
    for idx in range(num_steps):
        losses[f"loss_importance_vector_{idx}"] = imp[idx]
    return losses, target_preds


# ----------------------------- MAML++ multi-step loss weights ----------------------
def get_per_step_loss_importance_vector(num_steps, multi_step_loss_num_epochs,
                                        current_epoch):
    loss_weights = np.ones(num_steps) * (1.0 / num_steps)
    decay_rate = 1.0 / num_steps / multi_step_loss_num_epochs
    min_value_for_non_final_losses = 0.03 / num_steps
    for i in range(num_steps - 1):
        loss_weights[i] = np.maximum(loss_weights[i] - current_epoch * decay_rate,
                                     min_value_for_non_final_losses)
    loss_weights[-1] = np.minimum(
        loss_weights[-1] + current_epoch * (num_steps - 1) * decay_rate,
        1.0 - (num_steps - 1) * min_value_for_non_final_losses)
    return jnp.asarray(loss_weights, dtype=jnp.float32)


# ----------------------------- pure-JAX reference (for sanity) ---------------------
def reference_forward(xs, ys, xt, yt, w0, b0, lrs, imp):
    task_losses, preds_out = [], []
    for ti in range(xs.shape[0]):
        w, b = w0, b0
        loss_acc = jnp.float32(0.0)
        logits_t = None
        for step in range(lrs.shape[0]):
            logits_s = xs[ti] @ w + b
            g = (jax.nn.softmax(logits_s, -1) - jax.nn.softmax(ys[ti], -1)) / xs.shape[1]
            w = w - lrs[step] * (xs[ti].T @ g)
            b = b - lrs[step] * jnp.sum(g, axis=0, keepdims=True)
            logits_t = xt[ti] @ w + b
            tl = -jnp.mean(jnp.sum(jax.nn.log_softmax(logits_t, -1)
                                   * jax.nn.softmax(yt[ti], -1), -1))
            loss_acc = loss_acc + imp[step] * tl
        task_losses.append(loss_acc)
        preds_out.append(logits_t)
    return jnp.stack(task_losses), jnp.stack(preds_out)


# TODO(synk): autograd through an arbitrary user-supplied `classifier_class`,
# batch-norm running-stat backup/restore and the Adam/cosine outer-loop optimizer
# have no Pallas equivalent; the inner-loop gradients here are the closed-form
# gradients of the implemented linear base learner (exact for this model).

if __name__ == "__main__":
    # Small shapes consistent with the forward: tasks=8 (4 per grid step),
    # support/target=8 examples, images 4x8x8 (NCHW) -> D=256, n_classes=8,
    # inner-loop steps=3.
    NUM_TASKS, N_SUPPORT, N_TARGET = 8, 8, 8
    C_IMG, H, W = 4, 8, 8
    D = C_IMG * H * W
    N_CLASSES = 8
    NUM_STEPS = 3
    TASK_BLOCK = 4
    INIT_INNER_LR = 0.1
    MSL_EPOCHS = 10
    CURRENT_EPOCH = 0

    key = jax.random.PRNGKey(0)
    k1, k2, k3, k4, k5 = jax.random.split(key, 5)

    x_support = jax.random.normal(k1, (NUM_TASKS, N_SUPPORT, C_IMG, H, W), jnp.float32)
    x_target = jax.random.normal(k2, (NUM_TASKS, N_TARGET, C_IMG, H, W), jnp.float32)
    y_support = jax.random.normal(k3, (NUM_TASKS, N_SUPPORT, N_CLASSES), jnp.float32)
    y_target = jax.random.normal(k4, (NUM_TASKS, N_TARGET, N_CLASSES), jnp.float32)

    # NCHW -> flattened [task, n, D]
    xs = x_support.reshape(NUM_TASKS, N_SUPPORT, D)
    xt = x_target.reshape(NUM_TASKS, N_TARGET, D)

    # Deterministic synthetic meta-parameters of the base classifier.
    w0 = 0.02 * jax.random.normal(k5, (D, N_CLASSES), jnp.float32)
    b0 = jnp.zeros((1, N_CLASSES), jnp.float32)

    # LSLR per-step learning rates (all initialized to init_inner_loop_learning_rate).
    lrs = jnp.full((NUM_STEPS,), INIT_INNER_LR, dtype=jnp.float32)
    imp = get_per_step_loss_importance_vector(NUM_STEPS, MSL_EPOCHS, CURRENT_EPOCH)

    losses, per_task_target_preds = maml_forward(xs, y_support, xt, y_target,
                                                 w0, b0, lrs, imp,
                                                 task_block=TASK_BLOCK)
    jax.block_until_ready(per_task_target_preds)
    jax.block_until_ready(losses["loss"])

    # Sanity check against a pure-JAX reference of the same computation.
    # (Slightly relaxed tolerance: the per-step support softmax uses the EUP
    # approximate reciprocal.)
    ref_losses, ref_preds = reference_forward(xs, y_support, xt, y_target, w0, b0,
                                              lrs, imp)
    np.testing.assert_allclose(np.asarray(losses["loss"]),
                               np.asarray(jnp.mean(ref_losses)),
                               rtol=5e-3, atol=5e-3)
    np.testing.assert_allclose(np.asarray(per_task_target_preds),
                               np.asarray(ref_preds), rtol=5e-3, atol=5e-3)

    print("KERNEL_OK")
</pallas_src>

<mosaic_0001>
module attributes {stable_mosaic.version = 11 : i64} {
  func.func @maml_task_kernel(%arg0: i32, %arg1: memref<3xf32, #tpu.memory_space<smem>>, %arg2: memref<3xf32, #tpu.memory_space<smem>>, %arg3: memref<4x8x256xf32, #tpu.memory_space<vmem>>, %arg4: memref<4x8x8xf32, #tpu.memory_space<vmem>>, %arg5: memref<4x8x256xf32, #tpu.memory_space<vmem>>, %arg6: memref<4x8x8xf32, #tpu.memory_space<vmem>>, %arg7: memref<8x256xf32, #tpu.memory_space<vmem>>, %arg8: memref<1x8xf32, #tpu.memory_space<vmem>>, %arg9: memref<4x1x1xf32, #tpu.memory_space<vmem>>, %arg10: memref<4x8x8xf32, #tpu.memory_space<vmem>>) attributes {dimension_semantics = [#tpu.dimension_semantics<parallel>], iteration_bounds = array<i64: 2>, scalar_prefetch = 2 : i64, scratch_operands = 0 : i64, tpu.core_type = #tpu.core_type<tc>, window_params = [{transform_indices = @transform_0, window_bounds = array<i64: 4, 8, 256>}, {transform_indices = @transform_1, window_bounds = array<i64: 4, 8, 8>}, {transform_indices = @transform_2, window_bounds = array<i64: 4, 8, 256>}, {transform_indices = @transform_3, window_bounds = array<i64: 4, 8, 8>}, {pipeline_mode = #tpu.pipeline_mode<synchronous>, transform_indices = @transform_4, window_bounds = array<i64: 8, 256>}, {pipeline_mode = #tpu.pipeline_mode<synchronous>, transform_indices = @transform_5, window_bounds = array<i64: 1, 8>}, {transform_indices = @transform_6, window_bounds = array<i64: 4, 1, 1>}, {transform_indices = @transform_7, window_bounds = array<i64: 4, 8, 8>}]} {
    %c0 = arith.constant 0 : index
    %c0_0 = arith.constant 0 : index
    %c0_1 = arith.constant 0 : index
    %0 = vector.load %arg3[%c0, %c0_0, %c0_1] : memref<4x8x256xf32, #tpu.memory_space<vmem>>, vector<4x8x256xf32>
    %c0_2 = arith.constant 0 : index
    %c0_3 = arith.constant 0 : index
    %c0_4 = arith.constant 0 : index
    %1 = vector.load %arg5[%c0_2, %c0_3, %c0_4] : memref<4x8x256xf32, #tpu.memory_space<vmem>>, vector<4x8x256xf32>
    %c0_5 = arith.constant 0 : index
    %c0_6 = arith.constant 0 : index
    %c0_7 = arith.constant 0 : index
    %2 = vector.load %arg4[%c0_5, %c0_6, %c0_7] : memref<4x8x8xf32, #tpu.memory_space<vmem>>, vector<4x8x8xf32>
    %cst = arith.constant dense<0xFF800000> : vector<4x8xf32>
    %3 = vector.multi_reduction <maximumf>, %2, %cst [2] : vector<4x8x8xf32> to vector<4x8xf32>
    %4 = vector.shape_cast %3 : vector<4x8xf32> to vector<4x8x1xf32>
    %5 = vector.broadcast %4 : vector<4x8x1xf32> to vector<4x8x8xf32>
    %6 = arith.subf %2, %5 : vector<4x8x8xf32>
    %7 = math.exp %6 : vector<4x8x8xf32>
    %cst_8 = arith.constant dense<0.000000e+00> : vector<4x8xf32>
    %8 = vector.multi_reduction <add>, %7, %cst_8 [2] : vector<4x8x8xf32> to vector<4x8xf32>
    %9 = vector.shape_cast %8 : vector<4x8xf32> to vector<4x8x1xf32>
    %10 = tpu.reciprocal %9 : vector<4x8x1xf32> -> vector<4x8x1xf32>
    %11 = vector.broadcast %10 : vector<4x8x1xf32> to vector<4x8x8xf32>
    %12 = arith.mulf %7, %11 : vector<4x8x8xf32>
    %c0_9 = arith.constant 0 : index
    %c0_10 = arith.constant 0 : index
    %c0_11 = arith.constant 0 : index
    %13 = vector.load %arg6[%c0_9, %c0_10, %c0_11] : memref<4x8x8xf32, #tpu.memory_space<vmem>>, vector<4x8x8xf32>
    %cst_12 = arith.constant dense<0xFF800000> : vector<4x8xf32>
    %14 = vector.multi_reduction <maximumf>, %13, %cst_12 [2] : vector<4x8x8xf32> to vector<4x8xf32>
    %15 = vector.shape_cast %14 : vector<4x8xf32> to vector<4x8x1xf32>
    %16 = vector.broadcast %15 : vector<4x8x1xf32> to vector<4x8x8xf32>
    %17 = arith.subf %13, %16 : vector<4x8x8xf32>
    %18 = math.exp %17 : vector<4x8x8xf32>
    %cst_13 = arith.constant dense<0.000000e+00> : vector<4x8xf32>
    %19 = vector.multi_reduction <add>, %18, %cst_13 [2] : vector<4x8x8xf32> to vector<4x8xf32>
    %20 = vector.shape_cast %19 : vector<4x8xf32> to vector<4x8x1xf32>
    %21 = tpu.reciprocal %20 : vector<4x8x1xf32> -> vector<4x8x1xf32>
    %22 = vector.broadcast %21 : vector<4x8x1xf32> to vector<4x8x8xf32>
    %23 = arith.mulf %18, %22 : vector<4x8x8xf32>
    %c0_14 = arith.constant 0 : index
    %c0_15 = arith.constant 0 : index
    %24 = vector.load %arg7[%c0_14, %c0_15] : memref<8x256xf32, #tpu.memory_space<vmem>>, vector<8x256xf32>
    %25 = vector.shape_cast %24 : vector<8x256xf32> to vector<1x8x256xf32>
    %26 = vector.shape_cast %25 : vector<1x8x256xf32> to vector<1x8x256xf32>
    %27 = vector.broadcast %26 : vector<1x8x256xf32> to vector<4x8x256xf32>
    %c0_16 = arith.constant 0 : index
    %c0_17 = arith.constant 0 : index
    %28 = vector.load %arg8[%c0_16, %c0_17] : memref<1x8xf32, #tpu.memory_space<vmem>>, vector<1x8xf32>
    %29 = vector.shape_cast %28 : vector<1x8xf32> to vector<1x8xf32>
    %30 = vector.broadcast %29 : vector<1x8xf32> to vector<4x8xf32>
    %cst_18 = arith.constant 0.000000e+00 : f32
    %31 = vector.broadcast %cst_18 : f32 to vector<4x1xf32>
    "tpu.trace_start"() <{level = 10 : i32, message = "bnd,bcd->bnc"}> : () -> ()
    %cst_19 = arith.constant dense<0.000000e+00> : vector<4x8x8xf32>
    %32 = tpu.matmul %0, %27, %cst_19 {dimension_numbers = #tpu.dot_dimension_numbers<[2], [2], [1], [1], [0, 0, 0, 1, 1, 1], [0], [0]>} : vector<4x8x256xf32>, vector<4x8x256xf32>, vector<4x8x8xf32> -> vector<4x8x8xf32>
    "tpu.trace_stop"() : () -> ()
    %33 = vector.shape_cast %30 : vector<4x8xf32> to vector<4x1x8xf32>
    %34 = vector.broadcast %33 : vector<4x1x8xf32> to vector<4x8x8xf32>
    %35 = arith.addf %32, %34 : vector<4x8x8xf32>
    %cst_20 = arith.constant dense<0xFF800000> : vector<4x8xf32>
    %36 = vector.multi_reduction <maximumf>, %35, %cst_20 [2] : vector<4x8x8xf32> to vector<4x8xf32>
    %37 = vector.shape_cast %36 : vector<4x8xf32> to vector<4x8x1xf32>
    %38 = vector.broadcast %37 : vector<4x8x1xf32> to vector<4x8x8xf32>
    %39 = arith.subf %35, %38 : vector<4x8x8xf32>
    %40 = math.exp %39 : vector<4x8x8xf32>
    %cst_21 = arith.constant dense<0.000000e+00> : vector<4x8xf32>
    %41 = vector.multi_reduction <add>, %40, %cst_21 [2] : vector<4x8x8xf32> to vector<4x8xf32>
    %42 = vector.shape_cast %41 : vector<4x8xf32> to vector<4x8x1xf32>
    %43 = tpu.reciprocal %42 {approx = true} : vector<4x8x1xf32> -> vector<4x8x1xf32>
    %44 = vector.broadcast %43 : vector<4x8x1xf32> to vector<4x8x8xf32>
    %45 = arith.mulf %40, %44 : vector<4x8x8xf32>
    %46 = arith.subf %45, %12 : vector<4x8x8xf32>
    %cst_22 = arith.constant 1.250000e-01 : f32
    %47 = vector.broadcast %cst_22 : f32 to vector<4x8x8xf32>
    %48 = arith.mulf %46, %47 : vector<4x8x8xf32>
    "tpu.trace_start"() <{level = 10 : i32, message = "bnc,bnd->bcd"}> : () -> ()
    %cst_23 = arith.constant dense<0.000000e+00> : vector<4x8x256xf32>
    %49 = tpu.matmul %48, %0, %cst_23 {dimension_numbers = #tpu.dot_dimension_numbers<[1], [1], [2], [2], [0, 0, 0, 2, 1, 2], [0], [0]>} : vector<4x8x8xf32>, vector<4x8x256xf32>, vector<4x8x256xf32> -> vector<4x8x256xf32>
    "tpu.trace_stop"() : () -> ()
    %cst_24 = arith.constant dense<0.000000e+00> : vector<4x8xf32>
    %50 = vector.multi_reduction <add>, %48, %cst_24 [1] : vector<4x8x8xf32> to vector<4x8xf32>
    %c0_25 = arith.constant 0 : index
    %51 = memref.load %arg1[%c0_25] : memref<3xf32, #tpu.memory_space<smem>>
    %52 = vector.broadcast %51 : f32 to vector<4x8x256xf32>
    %53 = arith.mulf %52, %49 : vector<4x8x256xf32>
    %54 = arith.subf %27, %53 : vector<4x8x256xf32>
    %55 = vector.broadcast %51 : f32 to vector<4x8xf32>
    %56 = arith.mulf %55, %50 : vector<4x8xf32>
    %57 = arith.subf %30, %56 : vector<4x8xf32>
    "tpu.trace_start"() <{level = 10 : i32, message = "bnd,bcd->bnc"}> : () -> ()
    %cst_26 = arith.constant dense<0.000000e+00> : vector<4x8x8xf32>
    %58 = tpu.matmul %1, %54, %cst_26 {dimension_numbers = #tpu.dot_dimension_numbers<[2], [2], [1], [1], [0, 0, 0, 1, 1, 1], [0], [0]>} : vector<4x8x256xf32>, vector<4x8x256xf32>, vector<4x8x8xf32> -> vector<4x8x8xf32>
    "tpu.trace_stop"() : () -> ()
    %59 = vector.shape_cast %57 : vector<4x8xf32> to vector<4x1x8xf32>
    %60 = vector.broadcast %59 : vector<4x1x8xf32> to vector<4x8x8xf32>
    %61 = arith.addf %58, %60 : vector<4x8x8xf32>
    %cst_27 = arith.constant dense<0xFF800000> : vector<4x8xf32>
    %62 = vector.multi_reduction <maximumf>, %61, %cst_27 [2] : vector<4x8x8xf32> to vector<4x8xf32>
    %63 = vector.shape_cast %62 : vector<4x8xf32> to vector<4x8x1xf32>
    %64 = vector.broadcast %63 : vector<4x8x1xf32> to vector<4x8x8xf32>
    %65 = arith.subf %61, %64 : vector<4x8x8xf32>
    %66 = math.exp %65 : vector<4x8x8xf32>
    %cst_28 = arith.constant dense<0.000000e+00> : vector<4x8xf32>
    %67 = vector.multi_reduction <add>, %66, %cst_28 [2] : vector<4x8x8xf32> to vector<4x8xf32>
    %68 = vector.shape_cast %67 : vector<4x8xf32> to vector<4x8x1xf32>
    %69 = math.log %68 : vector<4x8x1xf32>
    %70 = vector.broadcast %69 : vector<4x8x1xf32> to vector<4x8x8xf32>
    %71 = arith.subf %65, %70 : vector<4x8x8xf32>
    %72 = arith.mulf %71, %23 : vector<4x8x8xf32>
    %cst_29 = arith.constant dense<0.000000e+00> : vector<4x8xf32>
    %73 = vector.multi_reduction <add>, %72, %cst_29 [2] : vector<4x8x8xf32> to vector<4x8xf32>
    %cst_30 = arith.constant dense<0.000000e+00> : vector<4xf32>
    %74 = vector.multi_reduction <add>, %73, %cst_30 [1] : vector<4x8xf32> to vector<4xf32>
    %75 = vector.shape_cast %74 : vector<4xf32> to vector<4x1xf32>
    %cst_31 = arith.constant 0.000000e+00 : f32
    %76 = vector.broadcast %cst_31 : f32 to vector<4x1xf32>
    %77 = arith.subf %76, %75 : vector<4x1xf32>
    %cst_32 = arith.constant 1.250000e-01 : f32
    %78 = vector.broadcast %cst_32 : f32 to vector<4x1xf32>
    %79 = arith.mulf %77, %78 : vector<4x1xf32>
    %c0_33 = arith.constant 0 : index
    %80 = memref.load %arg2[%c0_33] : memref<3xf32, #tpu.memory_space<smem>>
    %81 = vector.broadcast %80 : f32 to vector<4x1xf32>
    %82 = arith.mulf %81, %79 : vector<4x1xf32>
    %83 = arith.addf %31, %82 : vector<4x1xf32>
    "tpu.trace_start"() <{level = 10 : i32, message = "bnd,bcd->bnc"}> : () -> ()
    %cst_34 = arith.constant dense<0.000000e+00> : vector<4x8x8xf32>
    %84 = tpu.matmul %0, %54, %cst_34 {dimension_numbers = #tpu.dot_dimension_numbers<[2], [2], [1], [1], [0, 0, 0, 1, 1, 1], [0], [0]>} : vector<4x8x256xf32>, vector<4x8x256xf32>, vector<4x8x8xf32> -> vector<4x8x8xf32>
    "tpu.trace_stop"() : () -> ()
    %85 = vector.shape_cast %57 : vector<4x8xf32> to vector<4x1x8xf32>
    %86 = vector.broadcast %85 : vector<4x1x8xf32> to vector<4x8x8xf32>
    %87 = arith.addf %84, %86 : vector<4x8x8xf32>
    %cst_35 = arith.constant dense<0xFF800000> : vector<4x8xf32>
    %88 = vector.multi_reduction <maximumf>, %87, %cst_35 [2] : vector<4x8x8xf32> to vector<4x8xf32>
    %89 = vector.shape_cast %88 : vector<4x8xf32> to vector<4x8x1xf32>
    %90 = vector.broadcast %89 : vector<4x8x1xf32> to vector<4x8x8xf32>
    %91 = arith.subf %87, %90 : vector<4x8x8xf32>
    %92 = math.exp %91 : vector<4x8x8xf32>
    %cst_36 = arith.constant dense<0.000000e+00> : vector<4x8xf32>
    %93 = vector.multi_reduction <add>, %92, %cst_36 [2] : vector<4x8x8xf32> to vector<4x8xf32>
    %94 = vector.shape_cast %93 : vector<4x8xf32> to vector<4x8x1xf32>
    %95 = tpu.reciprocal %94 {approx = true} : vector<4x8x1xf32> -> vector<4x8x1xf32>
    %96 = vector.broadcast %95 : vector<4x8x1xf32> to vector<4x8x8xf32>
    %97 = arith.mulf %92, %96 : vector<4x8x8xf32>
    %98 = arith.subf %97, %12 : vector<4x8x8xf32>
    %cst_37 = arith.constant 1.250000e-01 : f32
    %99 = vector.broadcast %cst_37 : f32 to vector<4x8x8xf32>
    %100 = arith.mulf %98, %99 : vector<4x8x8xf32>
    "tpu.trace_start"() <{level = 10 : i32, message = "bnc,bnd->bcd"}> : () -> ()
    %cst_38 = arith.constant dense<0.000000e+00> : vector<4x8x256xf32>
    %101 = tpu.matmul %100, %0, %cst_38 {dimension_numbers = #tpu.dot_dimension_numbers<[1], [1], [2], [2], [0, 0, 0, 2, 1, 2], [0], [0]>} : vector<4x8x8xf32>, vector<4x8x256xf32>, vector<4x8x256xf32> -> vector<4x8x256xf32>
    "tpu.trace_stop"() : () -> ()
    %cst_39 = arith.constant dense<0.000000e+00> : vector<4x8xf32>
    %102 = vector.multi_reduction <add>, %100, %cst_39 [1] : vector<4x8x8xf32> to vector<4x8xf32>
    %c1 = arith.constant 1 : index
    %103 = memref.load %arg1[%c1] : memref<3xf32, #tpu.memory_space<smem>>
    %104 = vector.broadcast %103 : f32 to vector<4x8x256xf32>
    %105 = arith.mulf %104, %101 : vector<4x8x256xf32>
    %106 = arith.subf %54, %105 : vector<4x8x256xf32>
    %107 = vector.broadcast %103 : f32 to vector<4x8xf32>
    %108 = arith.mulf %107, %102 : vector<4x8xf32>
    %109 = arith.subf %57, %108 : vector<4x8xf32>
    "tpu.trace_start"() <{level = 10 : i32, message = "bnd,bcd->bnc"}> : () -> ()
    %cst_40 = arith.constant dense<0.000000e+00> : vector<4x8x8xf32>
    %110 = tpu.matmul %1, %106, %cst_40 {dimension_numbers = #tpu.dot_dimension_numbers<[2], [2], [1], [1], [0, 0, 0, 1, 1, 1], [0], [0]>} : vector<4x8x256xf32>, vector<4x8x256xf32>, vector<4x8x8xf32> -> vector<4x8x8xf32>
    "tpu.trace_stop"() : () -> ()
    %111 = vector.shape_cast %109 : vector<4x8xf32> to vector<4x1x8xf32>
    %112 = vector.broadcast %111 : vector<4x1x8xf32> to vector<4x8x8xf32>
    %113 = arith.addf %110, %112 : vector<4x8x8xf32>
    %cst_41 = arith.constant dense<0xFF800000> : vector<4x8xf32>
    %114 = vector.multi_reduction <maximumf>, %113, %cst_41 [2] : vector<4x8x8xf32> to vector<4x8xf32>
    %115 = vector.shape_cast %114 : vector<4x8xf32> to vector<4x8x1xf32>
    %116 = vector.broadcast %115 : vector<4x8x1xf32> to vector<4x8x8xf32>
    %117 = arith.subf %113, %116 : vector<4x8x8xf32>
    %118 = math.exp %117 : vector<4x8x8xf32>
    %cst_42 = arith.constant dense<0.000000e+00> : vector<4x8xf32>
    %119 = vector.multi_reduction <add>, %118, %cst_42 [2] : vector<4x8x8xf32> to vector<4x8xf32>
    %120 = vector.shape_cast %119 : vector<4x8xf32> to vector<4x8x1xf32>
    %121 = math.log %120 : vector<4x8x1xf32>
    %122 = vector.broadcast %121 : vector<4x8x1xf32> to vector<4x8x8xf32>
    %123 = arith.subf %117, %122 : vector<4x8x8xf32>
    %124 = arith.mulf %123, %23 : vector<4x8x8xf32>
    %cst_43 = arith.constant dense<0.000000e+00> : vector<4x8xf32>
    %125 = vector.multi_reduction <add>, %124, %cst_43 [2] : vector<4x8x8xf32> to vector<4x8xf32>
    %cst_44 = arith.constant dense<0.000000e+00> : vector<4xf32>
    %126 = vector.multi_reduction <add>, %125, %cst_44 [1] : vector<4x8xf32> to vector<4xf32>
    %127 = vector.shape_cast %126 : vector<4xf32> to vector<4x1xf32>
    %cst_45 = arith.constant 0.000000e+00 : f32
    %128 = vector.broadcast %cst_45 : f32 to vector<4x1xf32>
    %129 = arith.subf %128, %127 : vector<4x1xf32>
    %cst_46 = arith.constant 1.250000e-01 : f32
    %130 = vector.broadcast %cst_46 : f32 to vector<4x1xf32>
    %131 = arith.mulf %129, %130 : vector<4x1xf32>
    %c1_47 = arith.constant 1 : index
    %132 = memref.load %arg2[%c1_47] : memref<3xf32, #tpu.memory_space<smem>>
    %133 = vector.broadcast %132 : f32 to vector<4x1xf32>
    %134 = arith.mulf %133, %131 : vector<4x1xf32>
    %135 = arith.addf %83, %134 : vector<4x1xf32>
    "tpu.trace_start"() <{level = 10 : i32, message = "bnd,bcd->bnc"}> : () -> ()
    %cst_48 = arith.constant dense<0.000000e+00> : vector<4x8x8xf32>
    %136 = tpu.matmul %0, %106, %cst_48 {dimension_numbers = #tpu.dot_dimension_numbers<[2], [2], [1], [1], [0, 0, 0, 1, 1, 1], [0], [0]>} : vector<4x8x256xf32>, vector<4x8x256xf32>, vector<4x8x8xf32> -> vector<4x8x8xf32>
    "tpu.trace_stop"() : () -> ()
    %137 = vector.shape_cast %109 : vector<4x8xf32> to vector<4x1x8xf32>
    %138 = vector.broadcast %137 : vector<4x1x8xf32> to vector<4x8x8xf32>
    %139 = arith.addf %136, %138 : vector<4x8x8xf32>
    %cst_49 = arith.constant dense<0xFF800000> : vector<4x8xf32>
    %140 = vector.multi_reduction <maximumf>, %139, %cst_49 [2] : vector<4x8x8xf32> to vector<4x8xf32>
    %141 = vector.shape_cast %140 : vector<4x8xf32> to vector<4x8x1xf32>
    %142 = vector.broadcast %141 : vector<4x8x1xf32> to vector<4x8x8xf32>
    %143 = arith.subf %139, %142 : vector<4x8x8xf32>
    %144 = math.exp %143 : vector<4x8x8xf32>
    %cst_50 = arith.constant dense<0.000000e+00> : vector<4x8xf32>
    %145 = vector.multi_reduction <add>, %144, %cst_50 [2] : vector<4x8x8xf32> to vector<4x8xf32>
    %146 = vector.shape_cast %145 : vector<4x8xf32> to vector<4x8x1xf32>
    %147 = tpu.reciprocal %146 {approx = true} : vector<4x8x1xf32> -> vector<4x8x1xf32>
    %148 = vector.broadcast %147 : vector<4x8x1xf32> to vector<4x8x8xf32>
    %149 = arith.mulf %144, %148 : vector<4x8x8xf32>
    %150 = arith.subf %149, %12 : vector<4x8x8xf32>
    %cst_51 = arith.constant 1.250000e-01 : f32
    %151 = vector.broadcast %cst_51 : f32 to vector<4x8x8xf32>
    %152 = arith.mulf %150, %151 : vector<4x8x8xf32>
    "tpu.trace_start"() <{level = 10 : i32, message = "bnc,bnd->bcd"}> : () -> ()
    %cst_52 = arith.constant dense<0.000000e+00> : vector<4x8x256xf32>
    %153 = tpu.matmul %152, %0, %cst_52 {dimension_numbers = #tpu.dot_dimension_numbers<[1], [1], [2], [2], [0, 0, 0, 2, 1, 2], [0], [0]>} : vector<4x8x8xf32>, vector<4x8x256xf32>, vector<4x8x256xf32> -> vector<4x8x256xf32>
    "tpu.trace_stop"() : () -> ()
    %cst_53 = arith.constant dense<0.000000e+00> : vector<4x8xf32>
    %154 = vector.multi_reduction <add>, %152, %cst_53 [1] : vector<4x8x8xf32> to vector<4x8xf32>
    %c2 = arith.constant 2 : index
    %155 = memref.load %arg1[%c2] : memref<3xf32, #tpu.memory_space<smem>>
    %156 = vector.broadcast %155 : f32 to vector<4x8x256xf32>
    %157 = arith.mulf %156, %153 : vector<4x8x256xf32>
    %158 = arith.subf %106, %157 : vector<4x8x256xf32>
    %159 = vector.broadcast %155 : f32 to vector<4x8xf32>
    %160 = arith.mulf %159, %154 : vector<4x8xf32>
    %161 = arith.subf %109, %160 : vector<4x8xf32>
    "tpu.trace_start"() <{level = 10 : i32, message = "bnd,bcd->bnc"}> : () -> ()
    %cst_54 = arith.constant dense<0.000000e+00> : vector<4x8x8xf32>
    %162 = tpu.matmul %1, %158, %cst_54 {dimension_numbers = #tpu.dot_dimension_numbers<[2], [2], [1], [1], [0, 0, 0, 1, 1, 1], [0], [0]>} : vector<4x8x256xf32>, vector<4x8x256xf32>, vector<4x8x8xf32> -> vector<4x8x8xf32>
    "tpu.trace_stop"() : () -> ()
    %163 = vector.shape_cast %161 : vector<4x8xf32> to vector<4x1x8xf32>
    %164 = vector.broadcast %163 : vector<4x1x8xf32> to vector<4x8x8xf32>
    %165 = arith.addf %162, %164 : vector<4x8x8xf32>
    %cst_55 = arith.constant dense<0xFF800000> : vector<4x8xf32>
    %166 = vector.multi_reduction <maximumf>, %165, %cst_55 [2] : vector<4x8x8xf32> to vector<4x8xf32>
    %167 = vector.shape_cast %166 : vector<4x8xf32> to vector<4x8x1xf32>
    %168 = vector.broadcast %167 : vector<4x8x1xf32> to vector<4x8x8xf32>
    %169 = arith.subf %165, %168 : vector<4x8x8xf32>
    %170 = math.exp %169 : vector<4x8x8xf32>
    %cst_56 = arith.constant dense<0.000000e+00> : vector<4x8xf32>
    %171 = vector.multi_reduction <add>, %170, %cst_56 [2] : vector<4x8x8xf32> to vector<4x8xf32>
    %172 = vector.shape_cast %171 : vector<4x8xf32> to vector<4x8x1xf32>
    %173 = math.log %172 : vector<4x8x1xf32>
    %174 = vector.broadcast %173 : vector<4x8x1xf32> to vector<4x8x8xf32>
    %175 = arith.subf %169, %174 : vector<4x8x8xf32>
    %176 = arith.mulf %175, %23 : vector<4x8x8xf32>
    %cst_57 = arith.constant dense<0.000000e+00> : vector<4x8xf32>
    %177 = vector.multi_reduction <add>, %176, %cst_57 [2] : vector<4x8x8xf32> to vector<4x8xf32>
    %cst_58 = arith.constant dense<0.000000e+00> : vector<4xf32>
    %178 = vector.multi_reduction <add>, %177, %cst_58 [1] : vector<4x8xf32> to vector<4xf32>
    %179 = vector.shape_cast %178 : vector<4xf32> to vector<4x1xf32>
    %cst_59 = arith.constant 0.000000e+00 : f32
    %180 = vector.broadcast %cst_59 : f32 to vector<4x1xf32>
    %181 = arith.subf %180, %179 : vector<4x1xf32>
    %cst_60 = arith.constant 1.250000e-01 : f32
    %182 = vector.broadcast %cst_60 : f32 to vector<4x1xf32>
    %183 = arith.mulf %181, %182 : vector<4x1xf32>
    %c2_61 = arith.constant 2 : index
    %184 = memref.load %arg2[%c2_61] : memref<3xf32, #tpu.memory_space<smem>>
    %185 = vector.broadcast %184 : f32 to vector<4x1xf32>
    %186 = arith.mulf %185, %183 : vector<4x1xf32>
    %187 = arith.addf %135, %186 : vector<4x1xf32>
    %c0_62 = arith.constant 0 : index
    %c0_63 = arith.constant 0 : index
    %c0_64 = arith.constant 0 : index
    %188 = vector.load %arg10[%c0_62, %c0_63, %c0_64] : memref<4x8x8xf32, #tpu.memory_space<vmem>>, vector<4x8x8xf32>
    tpu.vector_store %arg10[%c0_62, %c0_63, %c0_64], %165 {strides = array<i32>} : memref<4x8x8xf32, #tpu.memory_space<vmem>>, vector<4x8x8xf32>,
    %189 = vector.shape_cast %187 : vector<4x1xf32> to vector<4x1x1xf32>
    %c0_65 = arith.constant 0 : index
    %c0_66 = arith.constant 0 : index
    %c0_67 = arith.constant 0 : index
    %190 = vector.load %arg9[%c0_65, %c0_66, %c0_67] : memref<4x1x1xf32, #tpu.memory_space<vmem>>, vector<4x1x1xf32>
    tpu.vector_store %arg9[%c0_65, %c0_66, %c0_67], %189 {strides = array<i32>} : memref<4x1x1xf32, #tpu.memory_space<vmem>>, vector<4x1x1xf32>,
    return
  }
  func.func @transform_0(%arg0: i32, %arg1: memref<3xf32, #tpu.memory_space<smem>>, %arg2: memref<3xf32, #tpu.memory_space<smem>>) -> (i32, i32, i32) {
    %c0_i32 = arith.constant 0 : i32
    %c0_i32_0 = arith.constant 0 : i32
    %c0_i32_1 = arith.constant 0 : i32
    return %arg0, %c0_i32, %c0_i32_0 : i32, i32, i32
  }
  func.func @transform_1(%arg0: i32, %arg1: memref<3xf32, #tpu.memory_space<smem>>, %arg2: memref<3xf32, #tpu.memory_space<smem>>) -> (i32, i32, i32) {
    %c0_i32 = arith.constant 0 : i32
    %c0_i32_0 = arith.constant 0 : i32
    %c0_i32_1 = arith.constant 0 : i32
    return %arg0, %c0_i32, %c0_i32_0 : i32, i32, i32
  }
  func.func @transform_2(%arg0: i32, %arg1: memref<3xf32, #tpu.memory_space<smem>>, %arg2: memref<3xf32, #tpu.memory_space<smem>>) -> (i32, i32, i32) {
    %c0_i32 = arith.constant 0 : i32
    %c0_i32_0 = arith.constant 0 : i32
    %c0_i32_1 = arith.constant 0 : i32
    return %arg0, %c0_i32, %c0_i32_0 : i32, i32, i32
  }
  func.func @transform_3(%arg0: i32, %arg1: memref<3xf32, #tpu.memory_space<smem>>, %arg2: memref<3xf32, #tpu.memory_space<smem>>) -> (i32, i32, i32) {
    %c0_i32 = arith.constant 0 : i32
    %c0_i32_0 = arith.constant 0 : i32
    %c0_i32_1 = arith.constant 0 : i32
    return %arg0, %c0_i32, %c0_i32_0 : i32, i32, i32
  }
  func.func @transform_4(%arg0: i32, %arg1: memref<3xf32, #tpu.memory_space<smem>>, %arg2: memref<3xf32, #tpu.memory_space<smem>>) -> (i32, i32) {
    %c0_i32 = arith.constant 0 : i32
    %c0_i32_0 = arith.constant 0 : i32
    %c0_i32_1 = arith.constant 0 : i32
    return %c0_i32, %c0_i32_0 : i32, i32
  }
  func.func @transform_5(%arg0: i32, %arg1: memref<3xf32, #tpu.memory_space<smem>>, %arg2: memref<3xf32, #tpu.memory_space<smem>>) -> (i32, i32) {
    %c0_i32 = arith.constant 0 : i32
    %c0_i32_0 = arith.constant 0 : i32
    %c0_i32_1 = arith.constant 0 : i32
    return %c0_i32, %c0_i32_0 : i32, i32
  }
  func.func @transform_6(%arg0: i32, %arg1: memref<3xf32, #tpu.memory_space<smem>>, %arg2: memref<3xf32, #tpu.memory_space<smem>>) -> (i32, i32, i32) {
    %c0_i32 = arith.constant 0 : i32
    %c0_i32_0 = arith.constant 0 : i32
    %c0_i32_1 = arith.constant 0 : i32
    return %arg0, %c0_i32, %c0_i32_0 : i32, i32, i32
  }
  func.func @transform_7(%arg0: i32, %arg1: memref<3xf32, #tpu.memory_space<smem>>, %arg2: memref<3xf32, #tpu.memory_space<smem>>) -> (i32, i32, i32) {
    %c0_i32 = arith.constant 0 : i32
    %c0_i32_0 = arith.constant 0 : i32
    %c0_i32_1 = arith.constant 0 : i32
    return %arg0, %c0_i32, %c0_i32_0 : i32, i32, i32
  }
}

</mosaic_0001>

<bundles_post_ra>
// kernel: tpu_custom_call.1
= control target key start
LH: loop header
LB: loop body
LE: loop exit
PB: predicated region body
PF: predicated region fallthrough
CT: control target
= control target key end

     0   :  { %s3944_s15 = smov [#allocation3]   ;;  %s3945_s16 = smov [#allocation4]   ;;  %s4979_s0 = inlined_call_operand.hbm [shape: f32[3], index: 0, kind: input, shape index: {}]   ;;  %s4980_s2 = inlined_call_operand.hbm [shape: f32[8,8,256], index: 2, kind: input, shape index: {}]   ;;  %s4981_s3 = inlined_call_operand.hbm [shape: f32[8,8,8], index: 3, kind: input, shape index: {}]   ;;  %s4982_s4 = inlined_call_operand.hbm [shape: f32[8,8,256], index: 4, kind: input, shape index: {}]   ;;  %s4983_s5 = inlined_call_operand.hbm [shape: f32[8,8,8], index: 5, kind: input, shape index: {}]   ;;  %s4984_s6 = inlined_call_operand.hbm [shape: f32[8,256], index: 6, kind: input, shape index: {}]   ;;  %s4985_s7 = inlined_call_operand.vmem [shape: f32[1,8], index: 7, kind: input, shape index: {}]   ;;  %s4986_s8 = inlined_call_operand.vmem [shape: f32[8,1,1], index: 8, kind: output, shape index: {0}]   ;;  %s4987_s9 = inlined_call_operand.hbm [shape: f32[8,8,8], index: 9, kind: output, shape index: {1}]   ;;  %s4988_s1 = inlined_call_operand.hbm [shape: f32[3], index: 1, kind: input, shape index: {}]  }
   0x1   :  { %5002 = sst [smem:[#allocation27_spill]] %s4981_s3  ;;  %s16_s11 = sshll.u32 %s4979_s0, 4  ;;  %s17_s11 = int_to_ptr.hbm [resolvable:$true] %s16_s11 }
   0x2   :  { %5003 = sst [smem:[#allocation28_spill]] %s4984_s6  ;;  %s21_s14 = sshll.u32 %s4988_s1, 4  ;;  %s22_s14 = int_to_ptr.hbm [resolvable:$true] %s21_s14 }
   0x3   :  { %5004 = sst [smem:[#allocation29_spill]] %s4986_s8 }
   0x4   :  { %5005 = sst [smem:[#allocation30_spill]] %s4987_s9 }
   0x5   :  { %19 = dma.hbm_to_smem %s17_s11, 16, %s3944_s15, [#allocation2] }
   0x6   :  { %24 = dma.hbm_to_smem %s22_s14, 16, %s3945_s16, [#allocation2] }
   0x7   :  { %3906 = dma.done.wait [#allocation2], 32 }
   0x8   :  { %3907 = vsyncadd [#allocation2], 4294967264 }
   0x9   :  { %27 = sfence }
   0xa   :  { %28 = vsyncpa [#allocation6], 0 }
   0xb   :  { %30 = vsyncpa [#allocation6 + $0x1], 0 }
   0xc   :  { %31 = vsyncpa [#allocation9], 0 }
   0xd   :  { %33 = vsyncpa [#allocation9 + $0x1], 0 }
   0xe   :  { %34 = vsyncpa [#allocation12], 0 }
   0xf   :  { %36 = vsyncpa [#allocation12 + $0x1], 0 }
  0x10   :  { %37 = vsyncpa [#allocation7], 0 }
  0x11   :  { %39 = vsyncpa [#allocation7 + $0x1], 0  ;;  %s4009_s0 = smov 0   ;;  %s4011_s1 = smov 0  }
  0x12   :  { %s4013_s17 = smov 0   ;;  %s4015_s18 = smov 0  }
  0x13 LB: > { %5006 = sst [smem:[#allocation21_spill]] %s3930_s0  ;;  %s4030_s19 = sadd.s32 4294967295, %s3942_s18   ;;  %s3942_s18 = sphi %s4015_s18, %s5050_s18   ;;  %s3938_s17 = sphi %s4013_s17, %s5052_s17   ;;  %s3934_s1 = sphi %s4011_s1, %s5054_s1   ;;  %s3930_s0 = sphi %s4009_s0, %s5053_s0  }
  0x14   : > { %5007 = sst [smem:[#allocation22_spill]] %s3938_s17  ;;  %s3404_s20 = sadd.s32 4294967294, %s3942_s18  }
  0x15   : > { %s4034_s21 = sadd.s32 1, %s3942_s18   ;;  %s52_s22 = sadd.s32 1, %s3938_s17 }
  0x16   : > { %5008 = sst [smem:[#allocation23_spill]] %s4034_s21  ;;  %s49_s23 = ssub.s32 %s3942_s18, %s4034_s21 }
  0x17   : > { %p59_p0 = scmp.ne.s32.totalorder %s3938_s17, %s3934_s1  ;;  %p50_p1 = scmp.eq.s32.totalorder %s49_s23, 0 }
  0x18   : > { %p60_p2 = scmp.eq.s32.totalorder %s3942_s18, 0  ;;  %p65_p3 = scmp.ne.s32.totalorder %s3934_s1, %s3930_s0 }
  0x19   : > { %p5001_p4 = scmp.eq.s32.totalorder %s4030_s19, 0  ;;  %p235_p7 = scmp.eq.s32.totalorder %s4030_s19, 1 }
  0x1a   : > { %s4046_s24 = scalar_select %p50_p1, %s3938_s17, %s52_s22  }
  0x1b   : > { %p4048_p5 = por %p60_p2, %p59_p0  ;;  %p4054_p6 = por %p5001_p4, %p65_p3 }
  0x1c   : > { %5009 = sst [smem:[#allocation24_spill]] %s4046_s24  ;;  %p241_p8 = scmp.eq.s32.totalorder %s3404_s20, 1 }
  0x1d   : > { %p3405_p9 = scmp.ge.s32.totalorder %s3942_s18, 1  ;;  %p248_p10 = scmp.lt.s32.totalorder %s3942_s18, 3 }
  0x1e   : > { %p4061_p11 = por %p235_p7, %p59_p0  ;;  %p4065_p12 = por %p241_p8, %p65_p3 }
  0x1f   : > { %p4069_p13 = pnand %p3405_p9, %p248_p10  ;;  %s5017_s6 = sld [smem:[#allocation28_spill]] }
  0x20   : > { %s5012_s27 = scalar_select %p4061_p11, 1, 0 }
  0x21   : > { %s5014_s28 = scalar_select %p4065_p12, 1, 0 }
  0x22   : > { %5013 = sst [smem:[#allocation25_spill]] %s5012_s27  ;;  %p3484_p1 = pneg %p4069_p13 }
  0x23   : > { %5015 = sst [smem:[#allocation26_spill]] %s5014_s28  ;;  %s3946_s12 = smov [#allocation13]  }
  0x24   : > { %s262_s13 = sshll.u32 %s3946_s12, 4  ;;  %p3485_p2 = pnand %p3484_p1, %p5001_p4  ;;  %s263_s13 = int_to_ptr.vmem [resolvable:$true] %s262_s13 }
  0x25   : > { %s260_s11 = sshll.u32 %s5017_s6, 4  ;;  %p3506_p3 = scmp.lt.s32.totalorder %s3942_s18, 2  ;;  %s261_s11 = int_to_ptr.hbm [resolvable:$true] %s260_s11 }
  0x26   : > { %s4083_s14 = sand.u32 1, %s3938_s17   ;;  %s4990_s15 = sand.u32 1, %s3942_s18  }
  0x27   : > { %3487 = dma.hbm_to_vmem [thread:$0]  (!%p3485_p2), %s261_s11, 256, %s263_s13, [#allocation12]  }
  0x28   : > { %p4088_p7 = pnand %p3506_p3, %p4048_p5  ;;  %s4989_s20 = sshll.u32 %s4083_s14, 5 }
  0x29   : > { %s3465_s22 = sshll.u32 %s3942_s18, 5  ;;  %s5019_s3 = sld [smem:[#allocation27_spill]] }
  0x2a   : > { %s303_s12 = scalar_lea.vmem [#allocation8], %s4989_s20  ;;  %s4101_s25 = scalar_lea.sflag [#allocation9], %s4990_s15 }
  0x2b   : > { %s311_s6 = sshll.u32 %s303_s12, 4  ;;  %p3746_p8 = pneg %p4088_p7  ;;  %s312_s6 = int_to_ptr.vmem [resolvable:$true] %s311_s6 }
  0x2f   : > { %s308_s10 = scalar_lea.hbm %s5019_s3, %s3465_s22  ;;  %s3749_s12 = scalar_lea.hbm %s5019_s3, 64 }
  0x30   : > { %s309_s24 = sshll.u32 %s308_s10, 4  ;;  %s310_s24 = int_to_ptr.hbm [resolvable:$true] %s309_s24 }
  0x31   : > { %s3742_s11 = sshra.s32 %s310_s24, 4  ;;  %s3743_s11 = int_to_ptr.hbm [resolvable:$true] %s3742_s11 }
  0x32   : > { %s3744_s13 = scalar_lea.hbm %s3743_s11, 32  ;;  %p3750_p1 = scmp.lt.s32.totalorder %s3743_s11, %s5019_s3 }
  0x33   : > { %p3745_p5 = scmp.ne.s32.totalorder %s3743_s11, %s3744_s13  ;;  %p3751_p2 = scmp.lt.s32.totalorder %s3749_s12, %s3744_s13 }
  0x35   : > { %p3747_p9 = pnand %p3746_p8, %p3745_p5  ;;  %p3752_p3 = por %p3751_p2, %p3750_p1 }
  0x37   : > { %p3748_p10 = pneg %p3747_p9 }
  0x39   : > { %p3753_p0 = pnand %p3752_p3, %p3748_p10 }
  0x3b   : > { %3756 = shalt.err (!%p3753_p0)
}
  0x3c   : > { %s4996_s15 = smov 128   ;;  %s4997_s17 = smov 8  }
  0x3d   : > { %3494 = dma.hbm_to_vmem [thread:$0]  (!%p4088_p7), %s310_s24, 512, %s312_s6, %s4101_s25, %s4996_s15, %s4996_s15, %s4997_s17  }
  0x3e   : > { %s353_s11 = scalar_lea.hbm %s4983_s5, %s3465_s22  ;;  %s5020_s30 = sshll.u32 %s4083_s14, 5 }
  0x3f   : > { %s354_s13 = sshll.u32 %s353_s11, 4  ;;  %s348_s12 = scalar_lea.vmem [#allocation11], %s5020_s30  ;;  %s4125_s13 = int_to_ptr.hbm [resolvable:$true] %s354_s13 }
  0x40   : > { %s356_s10 = sshll.u32 %s348_s12, 4  ;;  %s3408_s3 = sshll.u32 %s4083_s14, 6  ;;  %s4127_s10 = int_to_ptr.vmem [resolvable:$true] %s356_s10 }
  0x41   : > { %s3464_s21 = sshll.u32 %s3942_s18, 6  ;;  %s280_s6 = scalar_lea.vmem [#allocation5], %s3408_s3 }
  0x42   : > { %s286_s8 = scalar_lea.hbm %s4980_s2, %s3464_s21  ;;  %s289_s24 = sshll.u32 %s280_s6, 4  ;;  %s290_s24 = int_to_ptr.vmem [resolvable:$true] %s289_s24 }
  0x43   : > { %s287_s15 = sshll.u32 %s286_s8, 4  ;;  %s277_s22 = scalar_lea.sflag [#allocation6], %s4083_s14  ;;  %s288_s15 = int_to_ptr.hbm [resolvable:$true] %s287_s15 }
  0x44   : > { %s3772_s23 = sshra.s32 %s288_s15, 4  ;;  %s3779_s12 = scalar_lea.hbm %s4980_s2, 128  ;;  %s3773_s23 = int_to_ptr.hbm [resolvable:$true] %s3772_s23 }
  0x45   : > { %s3774_s20 = scalar_lea.hbm %s3773_s23, 64  ;;  %p3780_p10 = scmp.lt.s32.totalorder %s3773_s23, %s4980_s2 }
  0x46   : > { %p3775_p0 = scmp.ne.s32.totalorder %s3773_s23, %s3774_s20  ;;  %p3781_p1 = scmp.lt.s32.totalorder %s3779_s12, %s3774_s20 }
  0x48   : > { %p3777_p5 = pnand %p3775_p0, %p3746_p8  ;;  %p3782_p2 = por %p3781_p1, %p3780_p10 }
  0x4a   : > { %p3778_p9 = pneg %p3777_p5 }
  0x4c   : > { %p3783_p3 = pnand %p3782_p2, %p3778_p9 }
  0x4e   : > { %3786 = shalt.err (!%p3783_p3)
}
  0x4f   : > { %s3949_s8 = smov 256   ;;  %s3950_s14 = smov 16  }
  0x50   : > { %3491 = dma.hbm_to_vmem [thread:$0]  (!%p4088_p7), %s288_s15, 1024, %s290_s24, %s277_s22, %s3949_s8, %s3949_s8, %s3950_s14  }
  0x51   : > { %s331_s9 = scalar_lea.hbm %s4982_s4, %s3464_s21  ;;  %s325_s11 = scalar_lea.vmem [#allocation10], %s3408_s3 }
  0x52   : > { %s334_s30 = sshll.u32 %s325_s11, 4  ;;  %s332_s27 = sshll.u32 %s331_s9, 4  ;;  %s335_s30 = int_to_ptr.vmem [resolvable:$true] %s334_s30  ;;  %s333_s27 = int_to_ptr.hbm [resolvable:$true] %s332_s27 }
  0x53   : > { %s3802_s23 = sshra.s32 %s333_s27, 4  ;;  %s3809_s15 = scalar_lea.hbm %s4982_s4, 128  ;;  %s3803_s23 = int_to_ptr.hbm [resolvable:$true] %s3802_s23 }
  0x54   : > { %s3804_s20 = scalar_lea.hbm %s3803_s23, 64  ;;  %p3810_p10 = scmp.lt.s32.totalorder %s3803_s23, %s4982_s4 }
  0x55   : > { %p3805_p0 = scmp.ne.s32.totalorder %s3803_s23, %s3804_s20  ;;  %p3811_p1 = scmp.lt.s32.totalorder %s3809_s15, %s3804_s20 }
  0x57   : > { %p3807_p5 = pnand %p3805_p0, %p3746_p8  ;;  %p3812_p2 = por %p3811_p1, %p3810_p10 }
  0x59   : > { %p3808_p9 = pneg %p3807_p5 }
  0x5b   : > { %p3813_p3 = pnand %p3812_p2, %p3808_p9 }
  0x5d   : > { %3816 = shalt.err (!%p3813_p3)
}
  0x5e   : > { %3497 = dma.hbm_to_vmem [thread:$0]  (!%p4088_p7), %s333_s27, 1024, %s335_s30, %s4101_s25, %s3949_s8, %s3949_s8, %s3950_s14  }
  0x5f   : > { %s5021_s3 = sand.u32 1, %s3942_s18   ;;  %s3832_s21 = sshra.s32 %s4125_s13, 4  ;;  %s3833_s21 = int_to_ptr.hbm [resolvable:$true] %s3832_s21 }
  0x60   : > { %s345_s9 = scalar_lea.sflag [#allocation12], %s5021_s3  ;;  %s3834_s22 = scalar_lea.hbm %s3833_s21, 32 }
  0x61   : > { %p3835_p0 = scmp.ne.s32.totalorder %s3833_s21, %s3834_s22  ;;  %s3839_s11 = scalar_lea.hbm %s4983_s5, 64 }
  0x62   : > { %p3840_p9 = scmp.lt.s32.totalorder %s3833_s21, %s4983_s5  ;;  %p3841_p10 = scmp.lt.s32.totalorder %s3839_s11, %s3834_s22 }
  0x63   : > { %p3837_p5 = pnand %p3835_p0, %p3746_p8 }
  0x64   : > { %p3842_p1 = por %p3841_p10, %p3840_p9 }
  0x65   : > { %p3838_p4 = pneg %p3837_p5 }
  0x67   : > { %p3843_p2 = pnand %p3842_p1, %p3838_p4 }
  0x69   : > { %3846 = shalt.err (!%p3843_p2)
}
  0x6a   : > { %s5022_s27 = smov 8   ;;  %s5023_s25 = smov 128  }
  0x6b   : > { %3500 = dma.hbm_to_vmem [thread:$0]  (!%p4088_p7), %s4125_s13, 512, %s4127_s10, %s345_s9, %s5023_s25, %s5023_s25, %s5022_s27  }
  0x6c   : > { %368 = sbr.rel (%p4069_p13) target bundleno = 2908 (0xb5c), region = 44  ;;  %s4183_s8 = sand.u32 (!%p4069_p13), 1, %s3934_s1  }
  0x6d   : > { %s3423_s14 = sshll.u32 (!%p4069_p13), %s4183_s8, 6  ;;  %s371_s30 = scalar_lea.sflag (!%p4069_p13), [#allocation6], %s4183_s8 }
  0x6e   : > { %s4187_s12 = scalar_lea.vmem (!%p4069_p13), [#allocation5], %s3423_s14 }
  0x71   : > { %3909 = dma.done.wait (%p4054_p6), %s371_s30, 1024  }
  0x72   : > { %3911 = vsyncadd (%p4054_p6), %s371_s30, 4294966272  ;;  %s380_s29 = sand.u32 1, %s4030_s19   ;;  %s4195_s16 = sshll.u32 %s4183_s8, 5 }
  0x73   : > { %s381_s13 = scalar_lea.sflag [#allocation9], %s380_s29  ;;  %s4198_s10 = scalar_lea.vmem [#allocation8], %s4195_s16 }
  0x74   : > { %3913 = dma.done.wait (%p4054_p6), %s381_s13, 1536  }
  0x75   : > { %3915 = vsyncadd (%p4054_p6), %s381_s13, 4294965760  ;;  %s4204_s0 = scalar_lea.vmem [#allocation10], %s3423_s14  ;;  %s401_s15 = scalar_lea.sflag [#allocation12], %s380_s29 }
  0x76   : > { %s4207_s24 = scalar_lea.vmem [#allocation11], %s4195_s16 }
  0x77   : > { %3917 = dma.done.wait (%p4054_p6), %s401_s15, 512  }
  0x78   : > { %3919 = vsyncadd (%p4054_p6), %s401_s15, 4294966784  ;;  %p5024_p4 = scmp.eq.s32.totalorder %s4030_s19, 0 }
  0x7a   : > { %3921 = dma.done.wait (%p5024_p4), [#allocation12], 256   ;;  %p5025_p13 = pmov %p5024_p4 }
  0x7b   : > { %v4217_v0 = vld [vmem:[#allocation13] sm:$0xff]  ;;  %v4219_v1 = vld [vmem:[#allocation13 + $0x8] sm:$0xff]  ;;  %vm490_vm0 = vcmask 64512   ;;  %v4227_v3 = vld [vmem:[%s4187_s12 + $0x10] sm:$0xff]  ;;  %s1244_s3 = sld [smem:[#allocation3]]  ;;  %s4717_s22 = scalar_lea.vmem [#allocation14], %s4195_s16 }
  0x7c   : > { %3923 = vsyncadd (%p5025_p13), [#allocation12], 4294967040  ;;  %719 = vmatpush.xpose.msra.mxu0 %v4217_v0  ;;  %759 = vmatpush.xpose.msra.mxu2 %v4217_v0  ;;  %v4224_v2 = vld [vmem:[%s4187_s12] sm:$0xff]  ;;  %v4232_v4 = vld [vmem:[%s4187_s12 + $0x8] sm:$0xff]  ;;  %s3446_s9 = sld [smem:[#allocation3 + $0x1]]  ;;  %s3233_s6 = sshll.u32 %s4717_s22, 4  ;;  %s3234_s6 = int_to_ptr.vmem [resolvable:$true] %s3233_s6 }
  0x7d   : > { %739 = vmatpush.xpose.msra.mxu1 %v4219_v1  ;;  %779 = vmatpush.xpose.msra.mxu3 %v4219_v1  ;;  %v4235_v5 = vld [vmem:[%s4187_s12 + $0x18] sm:$0xff]  ;;  %v4238_v6 = vld [vmem:[%s4198_s10 + $0x8] sm:$0xff]  ;;  %v486_v8 = vld [vmem:[%s4198_s10] sm:$0xff]  ;;  %s3456_s21 = sld [smem:[#allocation3 + $0x2]]  ;;  %s3469_s11 = sshll.u32 %s4030_s19, 5 }
  0x7e   : > { %v494_v7 = vsel %vm490_vm0, %v4238_v6, -inf  ;;  %v491_v9 = vsel %vm490_vm0, %v486_v8, -inf  ;;  %v489_v10 = vld [vmem:[%s4198_s10 + $0x18] sm:$0xff]  ;;  %v4256_v11 = vld [vmem:[%s4187_s12 + $0x20] sm:$0xff]  ;;  %v4259_v12 = vld [vmem:[%s4187_s12 + $0x30] sm:$0xff]  ;;  %s5045_s27 = sld [smem:[#allocation30_spill]] }
  0x7f   : > { %720 = vmatmul.f32.vlgmr.msra.gmra.mxu0 %v4224_v2  ;;  %760 = vmatmul.f32.vlgmr.msra.gmra.mxu2 %v4227_v3  ;;  %v4264_v13 = vld [vmem:[%s4187_s12 + $0x28] sm:$0xff]  ;;  %v4267_v14 = vld [vmem:[%s4187_s12 + $0x38] sm:$0xff]  ;;  %v500_v15 = vsel %vm490_vm0, %v489_v10, -inf  ;;  %v4279_v16 = vld [vmem:[%s4198_s10 + $0x10] sm:$0xff]  ;;  %s3217_s30 = scalar_lea.sflag [#allocation7], %s4183_s8 }
  0x80   : > { %799 = vmatpush.xpose.msrb.mxu0 %v4217_v0  ;;  %839 = vmatpush.xpose.msrb.mxu2 %v4217_v0  ;;  %v497_v17 = vsel %vm490_vm0, %v4279_v16, -inf  ;;  %v4286_v19 = vld [vmem:[%s4985_s7] ss:$0 sm:$0xff] }
  0x81   : > { %740 = vmatmul.f32.vlgmr.msra.gmra.mxu1 %v4232_v4  ;;  %780 = vmatmul.f32.vlgmr.msra.gmra.mxu3 %v4235_v5  ;;  %v696_v20 = vperm.slane %v4286_v19, 0  ;;  %v693_v21 = vrot.slane %v4286_v19, 1  ;;  %v694_v28 = vrot.slane %v4286_v19, 2  ;;  %v695_v39 = vrot.slane %v4286_v19, 3 }
  0x82   : > { %495 = vmax.xlane.f32.xlu0 %v494_v7  ;;  %819 = vmatpush.xpose.msrb.mxu1 %v4219_v1 }
  0x83   : > { %859 = vmatpush.xpose.msrb.mxu3 %v4219_v1  ;;  %492 = vmax.xlane.f32.xlu2 %v491_v9  ;;  %v697_v32 = vperm.slane %v693_v21, 0  ;;  %v698_v34 = vperm.slane %v694_v28, 0  ;;  %v699_v48 = vperm.slane %v695_v39, 0 }
  0x84   : > { %1041 = vmatpush.msra.mxu2 %v4227_v3  ;;  %966 = vmatpush.msra.mxu0 %v4224_v2  ;;  %s3232_s25 = scalar_lea.hbm %s5045_s27, %s3469_s11  ;;  %s3882_s10 = scalar_lea.hbm %s5045_s27, 64 }
  0x85   : > { %s3235_s14 = sshll.u32 %s3232_s25, 4  ;;  %s3236_s14 = int_to_ptr.hbm [resolvable:$true] %s3235_s14 }
  0x86   : > { %986 = vmatpush.msra.mxu1 %v4232_v4 }
  0x87   : > { %1061 = vmatpush.msra.mxu3 %v4235_v5  ;;  %800 = vmatmul.f32.vlgmr.msrb.gmra.mxu0 %v4256_v11 }
  0x88   : > { %840 = vmatmul.f32.vlgmr.msrb.gmra.mxu2 %v4259_v12  ;;  %1116 = vmatpush.msrb.mxu0 %v4256_v11 }
  0x89   : > { %820 = vmatmul.f32.vlgmr.msrb.gmra.mxu1 %v4264_v13  ;;  %860 = vmatmul.f32.vlgmr.msrb.gmra.mxu3 %v4267_v14 }
  0x8a   : > { %501 = vmax.xlane.f32.xlu0 %v500_v15  ;;  %1191 = vmatpush.msrb.mxu2 %v4259_v12 }
  0x8b   : > { %1211 = vmatpush.msrb.mxu3 %v4267_v14  ;;  %1136 = vmatpush.msrb.mxu1 %v4264_v13 }
  0x8c   : > { %498 = vmax.xlane.f32.xlu2 %v497_v17 }
  0xf5   : > { %v496_v18 = vpop.xlane.xlu0 %495 }
  0xf6   : > { %v493_v22 = vpop.xlane.xlu2 %492  ;;  %v504_v40 = vsub.f32 %v4238_v6, %v496_v18 }
  0xf7   : > { %v503_v29 = vsub.f32 %v486_v8, %v493_v22 }
  0xf8   : > { %v509_v49 = vmul.f32 1.442695, %v504_v40 }
  0xf9   : > { %v507_v36 = vmul.f32 1.442695, %v503_v29 }
  0xfc   : > { %v721_v23 = vpop.f32.mrf.mxu0 }
  0xfd   : > { %v502_v24 = vpop.xlane.xlu0 %501  ;;  %v722_v25 = vadd.f32 %v721_v23, %v696_v20 }
  0xfe   : > { %v506_v26 = vsub.f32 %v489_v10, %v502_v24  ;;  %v741_v27 = vpop.f32.mrf.mxu1 }
  0xff   : > { %v4291_v31 = vadd.f32 %v741_v27, %v722_v25  ;;  %v499_v61 = vpop.xlane.xlu2 %498 }
 0x100   : > { %v513_v30 = vmul.f32 1.442695, %v506_v26  ;;  %v505_v63 = vsub.f32 %v4279_v16, %v499_v61 }
 0x101   : > { %v864_v33 = vsel %vm490_vm0, %v4291_v31, -inf }
 0x102   : > { %3552 = vpow2.f32 %v513_v30  ;;  %v761_v35 = vpop.f32.mrf.mxu2  ;;  %865 = vmax.xlane.f32.xlu0 %v864_v33  ;;  %v511_v10 = vmul.f32 1.442695, %v505_v63 }
 0x103   : > { %v762_v37 = vadd.f32 %v761_v35, %v697_v32  ;;  %3554 = vpow2.f32 %v507_v36 }
 0x104   : > { %v781_v38 = vpop.f32.mrf.mxu3  ;;  %v801_v41 = vpop.f32.mrf.mxu0  ;;  %3556 = vpow2.f32 %v509_v49 }
 0x105   : > { %v782_v42 = vadd.f32 %v781_v38, %v762_v37  ;;  %v802_v43 = vadd.f32 %v801_v41, %v698_v34 }
 0x106   : > { %v821_v44 = vpop.f32.mrf.mxu1 }
 0x107   : > { %v822_v46 = vadd.f32 %v821_v44, %v802_v43  ;;  %v867_v47 = vsel %vm490_vm0, %v782_v42, -inf }
 0x108   : > { %v4297_v45 = vpop.eup %3552  ;;  %868 = vmax.xlane.f32.xlu1 %v867_v47 }
 0x109   : > { %v524_v50 = vsel %vm490_vm0, %v4297_v45, 0.0  ;;  %v870_v51 = vsel %vm490_vm0, %v822_v46, -inf  ;;  %v4303_v55 = vpop.eup %3554 }
 0x10a   : > { %871 = vmax.xlane.f32.xlu2 %v870_v51  ;;  %525 = vadd.xlane.f32.xlu0 %v524_v50  ;;  %v515_v58 = vsel %vm490_vm0, %v4303_v55, 0.0  ;;  %v4308_v59 = vpop.eup %3556 }
 0x10b   : > { %v841_v52 = vpop.f32.mrf.mxu2  ;;  %v518_v60 = vsel %vm490_vm0, %v4308_v59, 0.0 }
 0x10c   : > { %v842_v53 = vadd.f32 %v841_v52, %v699_v48  ;;  %v861_v54 = vpop.f32.mrf.mxu3 }
 0x10e   : > { %v862_v56 = vadd.f32 %v861_v54, %v842_v53 }
 0x110   : > { %v873_v57 = vsel %vm490_vm0, %v862_v56, -inf }
 0x111   : > { %874 = vmax.xlane.f32.xlu1 %v873_v57 }
 0x112   : > { %516 = vadd.xlane.f32.xlu0 %v515_v58 }
 0x119   : > { %519 = vadd.xlane.f32.xlu1 %v518_v60 }
 0x175   : > { %v866_v17 = vpop.xlane.xlu0 %865 }
 0x176   : > { %v876_v22 = vsub.f32 %v4291_v31, %v866_v17 }
 0x178   : > { %v880_v27 = vmul.f32 1.442695, %v876_v22 }
 0x17b   : > { %v869_v62 = vpop.xlane.xlu1 %868 }
 0x17c   : > { %v877_v6 = vsub.f32 %v782_v42, %v869_v62 }
 0x17d   : > { %v872_v7 = vpop.xlane.xlu2 %871  ;;  %v526_v34 = vpop.xlane.xlu0 %525 }
 0x17e   : > { %v882_v8 = vmul.f32 1.442695, %v877_v6  ;;  %v878_v9 = vsub.f32 %v822_v46, %v872_v7  ;;  %vm574_vm5 = vweird.f32 %v526_v34  ;;  %v580_v53 = vand.u32 2147483648, %v526_v34 }
 0x17f   : > { %v578_v58 = vand.u32 2147483647, %v526_v34 }
 0x180   : > { %3558 = vpow2.f32 %v882_v8  ;;  %v884_v15 = vmul.f32 1.442695, %v878_v9  ;;  %v581_v8 = vor.u32 1.1754944e-38, %v580_v53 }
 0x181   : > { %vm579_vm8 = vcmp.eq.f32.partialorder %v578_v58, 8.507059e+37 }
 0x182   : > { %3560 = vpow2.f32 %v884_v15 }
 0x183   : > { %3562 = vpow2.f32 %v511_v10 }
 0x184   : > { %v875_v18 = vpop.xlane.xlu1 %874 }
 0x185   : > { %v879_v20 = vsub.f32 %v862_v56, %v875_v18  ;;  %v517_v37 = vpop.xlane.xlu0 %516 }
 0x186   : > { %v3559_v21 = vpop.eup %3558  ;;  %vm532_vm9 = vweird.f32 %v517_v37  ;;  %v536_v17 = vand.u32 2147483647, %v517_v37  ;;  %v538_v18 = vand.u32 2147483648, %v517_v37 }
 0x187   : > { %v886_v23 = vmul.f32 1.442695, %v879_v20  ;;  %v891_v24 = vsel %vm490_vm0, %v3559_v21, 0.0 }
 0x188   : > { %v4315_v25 = vpop.eup %3560  ;;  %892 = vadd.xlane.f32.xlu1 %v891_v24  ;;  %vm4351_vm12 = vcmp.eq.f32.partialorder %v536_v17, 8.507059e+37 }
 0x189   : > { %3564 = vpow2.f32 %v886_v23  ;;  %v894_v16 = vsel %vm490_vm0, %v4315_v25, 0.0  ;;  %v4319_v26 = vpop.eup %3562 }
 0x18a   : > { %895 = vadd.xlane.f32.xlu0 %v894_v16  ;;  %v521_v28 = vsel %vm490_vm0, %v4319_v26, 0.0  ;;  %3566 = vpow2.f32 %v880_v27  ;;  %v539_v27 = vor.u32 1.1754944e-38, %v538_v18 }
 0x18c   : > { %v520_v33 = vpop.xlane.xlu1 %519 }
 0x18d   : > { %3568 = vrcp.f32 %v520_v33  ;;  %vm546_vm1 = vweird.f32 %v520_v33  ;;  %v552_v42 = vand.u32 2147483648, %v520_v33  ;;  %v550_v47 = vand.u32 2147483647, %v520_v33 }
 0x18e   : > { %3570 = vrcp.f32 %v526_v34 }
 0x18f   : > { %v4323_v29 = vpop.eup %3564  ;;  %3572 = vrcp.f32 %v517_v37  ;;  %v553_v49 = vor.u32 1.1754944e-38, %v552_v42  ;;  %vm551_vm4 = vcmp.eq.f32.partialorder %v550_v47, 8.507059e+37 }
 0x190   : > { %v897_v30 = vsel %vm490_vm0, %v4323_v29, 0.0  ;;  %522 = vadd.xlane.f32.xlu1 %v521_v28  ;;  %v4327_v31 = vpop.eup %3566 }
 0x191   : > { %898 = vadd.xlane.f32.xlu2 %v897_v30  ;;  %v888_v32 = vsel %vm490_vm0, %v4327_v31, 0.0 }
 0x193   : > { %v3569_v35 = vpop.eup %3568 }
 0x194   : > { %v542_v36 = vmul.f32 %v3569_v35, %v520_v33  ;;  %v3571_v39 = vpop.eup %3570  ;;  %vm547_vm2 = vweird.f32 %v3569_v35 }
 0x195   : > { %v570_v40 = vmul.f32 %v3571_v39, %v526_v34  ;;  %v4331_v43 = vpop.eup %3572  ;;  %vm548_vm3 = vmor %vm546_vm1, %vm547_vm2  ;;  %vm575_vm6 = vweird.f32 %v3571_v39  ;;  %vm1270_vm2 = vcmask 1041409  }
 0x196   : > { %v543_v38 = vsub.f32 1.0, %v542_v36  ;;  %v528_v50 = vmul.f32 %v4331_v43, %v517_v37  ;;  %vm4334_vm7 = vmor %vm574_vm5, %vm575_vm6  ;;  %vm533_vm10 = vweird.f32 %v4331_v43 }
 0x197   : > { %v571_v44 = vsub.f32 1.0, %v570_v40  ;;  %vm4347_vm11 = vmor %vm532_vm9, %vm533_vm10 }
 0x198   : > { %v544_v41 = vmul.f32 %v3569_v35, %v543_v38  ;;  %v529_v54 = vsub.f32 1.0, %v528_v50 }
 0x199   : > { %889 = vadd.xlane.f32.xlu2 %v888_v32  ;;  %v572_v51 = vmul.f32 %v3571_v39, %v571_v44 }
 0x19a   : > { %v545_v46 = vadd.f32 %v3569_v35, %v544_v41  ;;  %v530_v9 = vmul.f32 %v4331_v43, %v529_v54 }
 0x19b   : > { %v573_v57 = vadd.f32 %v3571_v39, %v572_v51 }
 0x19c   : > { %v549_v52 = vsel %vm548_vm3, %v3569_v35, %v545_v46  ;;  %vm1272_vm3 = vcmask 1042434  }
 0x19d   : > { %v554_v56 = vsel %vm551_vm4, %v553_v49, %v549_v52  ;;  %v577_v15 = vsel %vm4334_vm7, %v3571_v39, %v573_v57  ;;  %vm1274_vm4 = vcmask 1043459  }
 0x19e   : > { %v4339_v6 = vmul.f32 %v4308_v59, %v554_v56  ;;  %v531_v59 = vadd.f32 %v4331_v43, %v530_v9  ;;  %v582_v22 = vsel %vm579_vm8, %v581_v8, %v577_v15 }
 0x19f   : > { %v4357_v34 = vmul.f32 %v4297_v45, %v582_v22 }
 0x1a0   : > { %v535_v37 = vsel %vm4347_vm11, %v4331_v43, %v531_v59 }
 0x1fb   : > { %v893_v48 = vpop.xlane.xlu1 %892 }
 0x1fc   : > { %3574 = vrcp.f32 %v893_v48 }
 0x202   : > { %v3575_v60 = vpop.eup %3574 }
 0x203   : > { %v523_v62 = vpop.xlane.xlu1 %522  ;;  %v905_v7 = vmul.f32 %v3575_v60, %v3559_v21  ;;  %v896_v21 = vpop.xlane.xlu0 %895 }
 0x204   : > { %v899_v63 = vpop.xlane.xlu2 %898  ;;  %3576 = vrcp.f32 %v523_v62  ;;  %v566_v35 = vand.u32 2147483648, %v523_v62  ;;  %vm560_vm13 = vweird.f32 %v523_v62  ;;  %v564_v39 = vand.u32 2147483647, %v523_v62 }
 0x205   : > { %3578 = vrcp.f32 %v899_v63  ;;  %v909_v10 = vsub.f32 %v905_v7, %v4339_v6 }
 0x206   : > { %3580 = vrcp.f32 %v896_v21  ;;  %v567_v45 = vor.u32 1.1754944e-38, %v566_v35  ;;  %vm565_vm1 = vcmp.eq.f32.partialorder %v564_v39, 8.507059e+37 }
 0x207   : > { %v913_v20 = vmul.f32 0.125, %v909_v10 }
 0x209   : > { %991 = vxpose.xlu1.b32.start.end [1/1] (short) (narrow) %v913_v20, 8  ;;  %v1223_v32 = vsel %vm490_vm0, %v913_v20, 0.0 }
 0x20a   : > { %v3577_v24 = vpop.eup %3576  ;;  %v1224_v40 = vrot.slane %v1223_v32, 4 }
 0x20b   : > { %v3579_v28 = vpop.eup %3578  ;;  %v556_v30 = vmul.f32 %v3577_v24, %v523_v62  ;;  %vm561_vm14 = vweird.f32 %v3577_v24 }
 0x20c   : > { %v890_v33 = vpop.xlane.xlu2 %889  ;;  %v907_v36 = vmul.f32 %v3579_v28, %v4323_v29  ;;  %vm4364_vm15 = vmor %vm560_vm13, %vm561_vm14  ;;  %v540_v29 = vsel %vm4351_vm12, %v539_v27, %v535_v37  ;;  %v3581_v47 = vpop.eup %3580  ;;  %v1225_v49 = vadd.f32 %v1224_v40, %v1223_v32  ;;  %v4385_v28 = vstv %s1244_s3 }
 0x20d   : > { %3582 = vrcp.f32 %v890_v33  ;;  %v557_v38 = vsub.f32 1.0, %v556_v30  ;;  %v4372_v52 = vmul.f32 %v4303_v55, %v540_v29  ;;  %v906_v61 = vmul.f32 %v3581_v47, %v4315_v25 }
 0x20e   : > { %v911_v41 = vsub.f32 %v907_v36, %v4357_v34  ;;  %v1226_v62 = vrot.slane %v1225_v49, 2 }
 0x20f   : > { %v558_v42 = vmul.f32 %v3577_v24, %v557_v38 }
 0x210   : > { %v915_v46 = vmul.f32 0.125, %v911_v41  ;;  %v1227_v9 = vadd.f32 %v1226_v62, %v1225_v49 }
 0x211   : > { %v559_v48 = vadd.f32 %v3577_v24, %v558_v42 }
 0x212   : > { %1141 = vxpose.xlu2.b32.start.end [1/1] (short) (narrow) %v915_v46, 8  ;;  %v1237_v50 = vsel %vm490_vm0, %v915_v46, 0.0  ;;  %v1228_v20 = vrot.slane %v1227_v9, 1 }
 0x213   : > { %v3583_v43 = vpop.eup %3582  ;;  %v1238_v51 = vrot.slane %v1237_v50, 4  ;;  %v563_v54 = vsel %vm4364_vm15, %v3577_v24, %v559_v48 }
 0x214   : > { %v904_v53 = vmul.f32 %v3583_v43, %v4327_v31  ;;  %v568_v56 = vsel %vm565_vm1, %v567_v45, %v563_v54  ;;  %v1229_v24 = vadd.f32 %v1228_v20, %v1227_v9  ;;  %v4418_v54 = vld [vmem:[%s4204_s0 + $0x18] sm:$0xff] }
 0x215   : > { %v1239_v57 = vadd.f32 %v1238_v51, %v1237_v50  ;;  %v4379_v60 = vmul.f32 %v4319_v26, %v568_v56 }
 0x216   : > { %v908_v58 = vsub.f32 %v904_v53, %v4372_v52  ;;  %v1263_v35 = vmul.f32 %v4385_v28, %v1229_v24  ;;  %v4415_v53 = vld [vmem:[%s4204_s0 + $0x10] sm:$0xff]  ;;  %v4473_v24 = vld [vmem:[%s4204_s0 + $0x20] sm:$0xff] }
 0x217   : > { %v910_v7 = vsub.f32 %v906_v61, %v4379_v60  ;;  %v1240_v55 = vrot.slane %v1239_v57, 2 }
 0x218   : > { %v912_v63 = vmul.f32 0.125, %v908_v58 }
 0x219   : > { %v914_v8 = vmul.f32 0.125, %v910_v7  ;;  %v1241_v18 = vadd.f32 %v1240_v55, %v1239_v57 }
 0x21a   : > { %916 = vxpose.xlu0.b32.start.end [1/1] (short) (narrow) %v912_v63, 8  ;;  %v1216_v31 = vsel %vm490_vm0, %v912_v63, 0.0 }
 0x21b   : > { %v1217_v10 = vrot.slane %v1216_v31, 4  ;;  %1066 = vxpose.xlu2.b32.start.end [1/1] (short) (narrow) %v914_v8, 8  ;;  %v1230_v15 = vsel %vm490_vm0, %v914_v8, 0.0  ;;  %v1242_v23 = vrot.slane %v1241_v18, 1 }
 0x21c   : > { %v1231_v26 = vrot.slane %v1230_v15, 4 }
 0x21d   : > { %v1218_v17 = vadd.f32 %v1217_v10, %v1216_v31  ;;  %v1243_v33 = vadd.f32 %v1242_v23, %v1241_v18  ;;  %v4454_v18 = vld [vmem:[%s4204_s0 + $0x8] sm:$0xff] }
 0x21e   : > { %v1232_v59 = vadd.f32 %v1231_v26, %v1230_v15  ;;  %v4441_v15 = vld [vmem:[%s4204_s0 + $0x30] sm:$0xff]  ;;  %v4451_v26 = vld [vmem:[%s4204_s0] sm:$0xff] }
 0x21f   : > { %v1219_v25 = vrot.slane %v1218_v17, 2  ;;  %v1265_v40 = vmul.f32 %v4385_v28, %v1243_v33 }
 0x220   : > { %v1233_v22 = vrot.slane %v1232_v59, 2 }
 0x221   : > { %v1220_v21 = vadd.f32 %v1219_v25, %v1218_v17  ;;  %v4444_v17 = vld [vmem:[%s4204_s0 + $0x38] sm:$0xff] }
 0x222   : > { %v1234_v27 = vadd.f32 %v1233_v22, %v1232_v59 }
 0x223   : > { %v1221_v16 = vrot.slane %v1220_v21, 1 }
 0x224   : > { %v1235_v32 = vrot.slane %v1234_v27, 1 }
 0x225   : > { %v1222_v30 = vadd.f32 %v1221_v16, %v1220_v21  ;;  %v4476_v16 = vld [vmem:[%s4204_s0 + $0x28] sm:$0xff] }
 0x226   : > { %v1236_v37 = vadd.f32 %v1235_v32, %v1234_v27 }
 0x227   : > { %v1262_v36 = vmul.f32 %v4385_v28, %v1222_v30 }
 0x228   : > { %v1264_v39 = vmul.f32 %v4385_v28, %v1236_v37 }
 0x229   : > { %v1271_v38 = vsel %vm1270_vm2, %v1263_v35, %v1262_v36 }
 0x22a   : > { %v1273_v41 = vsel %vm1272_vm3, %v1264_v39, %v1271_v38 }
 0x22b   : > { %v4394_v42 = vsel %vm1274_vm4, %v1265_v40, %v1273_v41 }
 0x2ab   : > { %v1157_v45 = vpop.trf.xlu2 }
 0x2ad   : > { %v1007_v44 = vpop.trf.xlu1 }
 0x2ae   : > { %3432 = vmatmul.msk.f32.vlgmr.msra.gmra.mxu2 %vm490_vm0, %v1007_v44  ;;  %3433 = vmatmul.msk.f32.vlgmr.msra.gmra.mxu3 %vm490_vm0, %v1007_v44 }
 0x2b4   : > { %v1082_v29 = vpop.trf.xlu2 }
 0x2b6   : > { %3436 = vmatmul.msk.f32.vlgmr.msrb.gmra.mxu2 %vm490_vm0, %v1157_v45  ;;  %3437 = vmatmul.msk.f32.vlgmr.msrb.gmra.mxu3 %vm490_vm0, %v1157_v45 }
 0x2be   : > { %v932_v46 = vpop.trf.xlu0 }
 0x2bf   : > { %3430 = vmatmul.msk.f32.vlgmr.msra.gmra.mxu0 %vm490_vm0, %v932_v46  ;;  %3431 = vmatmul.msk.f32.vlgmr.msra.gmra.mxu1 %vm490_vm0, %v932_v46 }
 0x2c7   : > { %3434 = vmatmul.msk.f32.vlgmr.msrb.gmra.mxu0 %vm490_vm0, %v1082_v29  ;;  %3435 = vmatmul.msk.f32.vlgmr.msrb.gmra.mxu1 %vm490_vm0, %v1082_v29 }
 0x331   : > { %v1043_v47 = vpop.f32.mrf.mxu2  ;;  %v1063_v48 = vpop.f32.mrf.mxu3 }
 0x332   : > { %v1248_v43 = vmul.f32 %v4385_v28, %v1043_v47  ;;  %v1249_v49 = vmul.f32 %v4385_v28, %v1063_v48 }
 0x334   : > { %v4407_v50 = vsub.f32 %v4217_v0, %v1248_v43  ;;  %v4410_v51 = vsub.f32 %v4219_v1, %v1249_v49 }
 0x336   : > { %1345 = vmatpush.xpose.msra.mxu2 %v4407_v50  ;;  %1365 = vmatpush.xpose.msra.mxu3 %v4410_v51 }
 0x339   : > { %v1193_v56 = vpop.f32.mrf.mxu2  ;;  %v1213_v57 = vpop.f32.mrf.mxu3  ;;  %1346 = vmatmul.f32.vlgmr.msra.gmra.mxu2 %v4415_v53  ;;  %1366 = vmatmul.f32.vlgmr.msra.gmra.mxu3 %v4418_v54 }
 0x33a   : > { %v1252_v58 = vmul.f32 %v4385_v28, %v1193_v56  ;;  %v1253_v61 = vmul.f32 %v4385_v28, %v1213_v57 }
 0x33c   : > { %v968_v62 = vpop.f32.mrf.mxu0  ;;  %v988_v63 = vpop.f32.mrf.mxu1  ;;  %v4425_v7 = vsub.f32 %v4217_v0, %v1252_v58  ;;  %v4428_v55 = vsub.f32 %v4219_v1, %v1253_v61 }
 0x33d   : > { %v1246_v31 = vmul.f32 %v4385_v28, %v968_v62  ;;  %v1247_v8 = vmul.f32 %v4385_v28, %v988_v63 }
 0x33e   : > { %1425 = vmatpush.xpose.msrb.mxu2 %v4425_v7  ;;  %1445 = vmatpush.xpose.msrb.mxu3 %v4428_v55 }
 0x33f   : > { %v4433_v9 = vsub.f32 %v4217_v0, %v1246_v31  ;;  %v4436_v10 = vsub.f32 %v4219_v1, %v1247_v8 }
 0x341   : > { %1305 = vmatpush.xpose.msra.mxu0 %v4433_v9  ;;  %1325 = vmatpush.xpose.msra.mxu1 %v4436_v10 }
 0x342   : > { %1593 = vmatpush.xpose.msra.mxu2 %v4407_v50  ;;  %1613 = vmatpush.xpose.msra.mxu3 %v4410_v51 }
 0x343   : > { %1426 = vmatmul.f32.vlgmr.msrb.gmra.mxu2 %v4441_v15  ;;  %1446 = vmatmul.f32.vlgmr.msrb.gmra.mxu3 %v4444_v17 }
 0x344   : > { %v1118_v20 = vpop.f32.mrf.mxu0  ;;  %1306 = vmatmul.f32.vlgmr.msra.gmra.mxu0 %v4451_v26  ;;  %v1138_v25 = vpop.f32.mrf.mxu1  ;;  %1326 = vmatmul.f32.vlgmr.msra.gmra.mxu1 %v4454_v18 }
 0x345   : > { %v1250_v59 = vmul.f32 %v4385_v28, %v1118_v20  ;;  %v1251_v21 = vmul.f32 %v4385_v28, %v1138_v25 }
 0x346   : > { %1673 = vmatpush.xpose.msrb.mxu2 %v4425_v7  ;;  %1693 = vmatpush.xpose.msrb.mxu3 %v4428_v55 }
 0x347   : > { %v4465_v22 = vsub.f32 %v4217_v0, %v1250_v59  ;;  %v4468_v23 = vsub.f32 %v4219_v1, %v1251_v21  ;;  %v4502_v0 = vsub.f32 %v4286_v19, %v4394_v42 }
 0x349   : > { %1385 = vmatpush.xpose.msrb.mxu0 %v4465_v22  ;;  %1405 = vmatpush.xpose.msrb.mxu1 %v4468_v23  ;;  %v1279_v1 = vrot.slane %v4502_v0, 1  ;;  %v1281_v27 = vrot.slane %v4502_v0, 3  ;;  %v1280_v19 = vrot.slane %v4502_v0, 2 }
 0x34b   : > { %1594 = vmatmul.f32.vlgmr.msra.gmra.mxu2 %v4227_v3  ;;  %1614 = vmatmul.f32.vlgmr.msra.gmra.mxu3 %v4235_v5  ;;  %v1285_v32 = vperm.slane %v1281_v27, 0  ;;  %v1284_v38 = vperm.slane %v1280_v19, 0 }
 0x34c   : > { %1386 = vmatmul.f32.vlgmr.msrb.gmra.mxu0 %v4473_v24  ;;  %1406 = vmatmul.f32.vlgmr.msrb.gmra.mxu1 %v4476_v16 }
 0x34d   : > { %1553 = vmatpush.xpose.msra.mxu0 %v4433_v9  ;;  %1573 = vmatpush.xpose.msra.mxu1 %v4436_v10 }
 0x34e   : > { %1875 = vmatpush.msra.mxu2 %v4227_v3  ;;  %1895 = vmatpush.msra.mxu3 %v4235_v5  ;;  %v1283_v3 = vperm.slane %v1279_v1, 0 }
 0x351   : > { %1633 = vmatpush.xpose.msrb.mxu0 %v4465_v22  ;;  %1653 = vmatpush.xpose.msrb.mxu1 %v4468_v23 }
 0x353   : > { %1674 = vmatmul.f32.vlgmr.msrb.gmra.mxu2 %v4259_v12  ;;  %1694 = vmatmul.f32.vlgmr.msrb.gmra.mxu3 %v4267_v14 }
 0x354   : > { %2025 = vmatpush.msrb.mxu2 %v4259_v12  ;;  %2045 = vmatpush.msrb.mxu3 %v4267_v14 }
 0x355   : > { %1554 = vmatmul.f32.vlgmr.msra.gmra.mxu0 %v4224_v2  ;;  %1574 = vmatmul.f32.vlgmr.msra.gmra.mxu1 %v4232_v4 }
 0x356   : > { %1800 = vmatpush.msra.mxu0 %v4224_v2  ;;  %1820 = vmatpush.msra.mxu1 %v4232_v4  ;;  %v1282_v4 = vperm.slane %v4502_v0, 0 }
 0x35d   : > { %1634 = vmatmul.f32.vlgmr.msrb.gmra.mxu0 %v4256_v11  ;;  %1654 = vmatmul.f32.vlgmr.msrb.gmra.mxu1 %v4264_v13 }
 0x35e   : > { %1950 = vmatpush.msrb.mxu0 %v4256_v11  ;;  %1970 = vmatpush.msrb.mxu1 %v4264_v13 }
 0x3bc   : > { %v1347_v5 = vpop.f32.mrf.mxu2  ;;  %v1367_v12 = vpop.f32.mrf.mxu3 }
 0x3bd   : > { %v1348_v2 = vadd.f32 %v1347_v5, %v1283_v3 }
 0x3bf   : > { %v4505_v14 = vadd.f32 %v1367_v12, %v1348_v2 }
 0x3c1   : > { %v1307_v28 = vpop.f32.mrf.mxu0  ;;  %v1327_v11 = vpop.f32.mrf.mxu1 }
 0x3c2   : > { %v1308_v30 = vadd.f32 %v1307_v28, %v1282_v4 }
 0x3c4   : > { %v4509_v13 = vadd.f32 %v1327_v11, %v1308_v30 }
 0x3c6   : > { %v1427_v33 = vpop.f32.mrf.mxu2  ;;  %v1447_v35 = vpop.f32.mrf.mxu3 }
 0x3c7   : > { %v1428_v36 = vadd.f32 %v1427_v33, %v1285_v32 }
 0x3c9   : > { %v4512_v37 = vadd.f32 %v1447_v35, %v1428_v36  ;;  %v1387_v39 = vpop.f32.mrf.mxu0  ;;  %v1407_v40 = vpop.f32.mrf.mxu1 }
 0x3ca   : > { %v1388_v41 = vadd.f32 %v1387_v39, %v1284_v38 }
 0x3cc   : > { %v4514_v42 = vadd.f32 %v1407_v40, %v1388_v41 }
 0x3ce   : > { %v1595_v44 = vpop.f32.mrf.mxu2  ;;  %v1615_v45 = vpop.f32.mrf.mxu3 }
 0x3cf   : > { %v1596_v46 = vadd.f32 %v1595_v44, %v1283_v3 }
 0x3d1   : > { %v1616_v29 = vadd.f32 %v1615_v45, %v1596_v46 }
 0x3d2   : > { %v1555_v47 = vpop.f32.mrf.mxu0  ;;  %v1575_v48 = vpop.f32.mrf.mxu1 }
 0x3d3   : > { %v1556_v43 = vadd.f32 %v1555_v47, %v1282_v4  ;;  %v1701_v49 = vsel %vm490_vm0, %v1616_v29, -inf }
 0x3d4   : > { %1702 = vmax.xlane.f32.xlu0 %v1701_v49 }
 0x3d5   : > { %v1576_v56 = vadd.f32 %v1575_v48, %v1556_v43 }
 0x3d6   : > { %v1675_v57 = vpop.f32.mrf.mxu2  ;;  %v1695_v58 = vpop.f32.mrf.mxu3 }
 0x3d7   : > { %v1676_v61 = vadd.f32 %v1675_v57, %v1285_v32  ;;  %v1698_v62 = vsel %vm490_vm0, %v1576_v56, -inf }
 0x3d8   : > { %1699 = vmax.xlane.f32.xlu1 %v1698_v62 }
 0x3d9   : > { %v1696_v63 = vadd.f32 %v1695_v58, %v1676_v61 }
 0x3da   : > { %v1635_v31 = vpop.f32.mrf.mxu0  ;;  %v1655_v8 = vpop.f32.mrf.mxu1 }
 0x3db   : > { %v1636_v20 = vadd.f32 %v1635_v31, %v1284_v38  ;;  %v1707_v25 = vsel %vm490_vm0, %v1696_v63, -inf }
 0x3dc   : > { %1708 = vmax.xlane.f32.xlu2 %v1707_v25 }
 0x3dd   : > { %v1656_v59 = vadd.f32 %v1655_v8, %v1636_v20 }
 0x3df   : > { %v1704_v21 = vsel %vm490_vm0, %v1656_v59, -inf }
 0x3e0   : > { %1705 = vmax.xlane.f32.xlu1 %v1704_v21 }
 0x447   : > { %v1703_v1 = vpop.xlane.xlu0 %1702 }
 0x448   : > { %v1711_v3 = vsub.f32 %v1616_v29, %v1703_v1 }
 0x44a   : > { %v1716_v5 = vmul.f32 1.442695, %v1711_v3 }
 0x44b   : > { %v1700_v12 = vpop.xlane.xlu1 %1699 }
 0x44c   : > { %3584 = vpow2.f32 %v1716_v5  ;;  %v1710_v2 = vsub.f32 %v1576_v56, %v1700_v12 }
 0x44e   : > { %v1714_v4 = vmul.f32 1.442695, %v1710_v2 }
 0x44f   : > { %v1709_v27 = vpop.xlane.xlu2 %1708 }
 0x450   : > { %3586 = vpow2.f32 %v1714_v4  ;;  %v1713_v28 = vsub.f32 %v1696_v63, %v1709_v27 }
 0x452   : > { %v3585_v11 = vpop.eup %3584  ;;  %v1720_v30 = vmul.f32 1.442695, %v1713_v28 }
 0x453   : > { %v1706_v32 = vpop.xlane.xlu1 %1705  ;;  %v1725_v19 = vsel %vm490_vm0, %v3585_v11, 0.0 }
 0x454   : > { %3588 = vpow2.f32 %v1720_v30  ;;  %v1712_v33 = vsub.f32 %v1656_v59, %v1706_v32  ;;  %1726 = vadd.xlane.f32.xlu0 %v1725_v19 }
 0x456   : > { %v3587_v35 = vpop.eup %3586  ;;  %v1718_v36 = vmul.f32 1.442695, %v1712_v33 }
 0x457   : > { %v1722_v38 = vsel %vm490_vm0, %v3587_v35, 0.0 }
 0x458   : > { %3590 = vpow2.f32 %v1718_v36  ;;  %1723 = vadd.xlane.f32.xlu2 %v1722_v38 }
 0x45a   : > { %v3589_v39 = vpop.eup %3588 }
 0x45b   : > { %v1731_v40 = vsel %vm490_vm0, %v3589_v39, 0.0 }
 0x45c   : > { %1732 = vadd.xlane.f32.xlu1 %v1731_v40 }
 0x45e   : > { %v3591_v41 = vpop.eup %3590 }
 0x45f   : > { %v1728_v44 = vsel %vm490_vm0, %v3591_v41, 0.0 }
 0x460   : > { %1729 = vadd.xlane.f32.xlu0 %v1728_v44 }
 0x4c7   : > { %v1727_v45 = vpop.xlane.xlu0 %1726 }
 0x4c8   : > { %3592 = vrcp.f32 %v1727_v45 }
 0x4cb   : > { %v1724_v46 = vpop.xlane.xlu2 %1723 }
 0x4cc   : > { %3594 = vrcp.f32 %v1724_v46 }
 0x4ce   : > { %v3593_v29 = vpop.eup %3592 }
 0x4cf   : > { %v1733_v47 = vpop.xlane.xlu1 %1732  ;;  %v1739_v48 = vmul.f32 %v3593_v29, %v3585_v11 }
 0x4d0   : > { %3596 = vrcp.f32 %v1733_v47 }
 0x4d1   : > { %v1743_v43 = vsub.f32 %v1739_v48, %v4339_v6 }
 0x4d2   : > { %v3595_v49 = vpop.eup %3594 }
 0x4d3   : > { %v1730_v56 = vpop.xlane.xlu0 %1729  ;;  %v1747_v57 = vmul.f32 0.125, %v1743_v43  ;;  %v1738_v58 = vmul.f32 %v3595_v49, %v3587_v35 }
 0x4d4   : > { %3598 = vrcp.f32 %v1730_v56 }
 0x4d5   : > { %1825 = vxpose.xlu1.b32.start.end [1/1] (short) (narrow) %v1747_v57, 8  ;;  %v2057_v61 = vsel %vm490_vm0, %v1747_v57, 0.0  ;;  %v1742_v62 = vsub.f32 %v1738_v58, %v4372_v52 }
 0x4d6   : > { %v3597_v63 = vpop.eup %3596  ;;  %v2058_v31 = vrot.slane %v2057_v61, 4 }
 0x4d7   : > { %v1746_v8 = vmul.f32 0.125, %v1742_v62  ;;  %v1741_v20 = vmul.f32 %v3597_v63, %v3589_v39 }
 0x4d8   : > { %v2059_v25 = vadd.f32 %v2058_v31, %v2057_v61 }
 0x4d9   : > { %v2050_v59 = vsel %vm490_vm0, %v1746_v8, 0.0  ;;  %1750 = vxpose.xlu0.b32.start.end [1/1] (short) (narrow) %v1746_v8, 8  ;;  %v1745_v21 = vsub.f32 %v1741_v20, %v4357_v34 }
 0x4da   : > { %v3599_v1 = vpop.eup %3598  ;;  %v2060_v3 = vrot.slane %v2059_v25, 2  ;;  %v2051_v5 = vrot.slane %v2050_v59, 4 }
 0x4db   : > { %v1749_v12 = vmul.f32 0.125, %v1745_v21  ;;  %v1740_v2 = vmul.f32 %v3599_v1, %v3591_v41  ;;  %v2079_v41 = vstv %s3446_s9 }
 0x4dc   : > { %v2061_v4 = vadd.f32 %v2060_v3, %v2059_v25  ;;  %v2052_v27 = vadd.f32 %v2051_v5, %v2050_v59 }
 0x4dd   : > { %1975 = vxpose.xlu2.b32.start.end [1/1] (short) (narrow) %v1749_v12, 8  ;;  %v2071_v28 = vsel %vm490_vm0, %v1749_v12, 0.0  ;;  %v1744_v11 = vsub.f32 %v1740_v2, %v4379_v60 }
 0x4de   : > { %v2062_v30 = vrot.slane %v2061_v4, 1  ;;  %v2053_v32 = vrot.slane %v2052_v27, 2  ;;  %v2072_v19 = vrot.slane %v2071_v28, 4 }
 0x4df   : > { %v1748_v33 = vmul.f32 0.125, %v1744_v11 }
 0x4e0   : > { %v2054_v35 = vadd.f32 %v2053_v32, %v2052_v27  ;;  %v2073_v36 = vadd.f32 %v2072_v19, %v2071_v28  ;;  %v2063_v39 = vadd.f32 %v2062_v30, %v2061_v4 }
 0x4e1   : > { %v2064_v38 = vsel %vm490_vm0, %v1748_v33, 0.0 }
 0x4e2   : > { %v2055_v40 = vrot.slane %v2054_v35, 1  ;;  %v2074_v44 = vrot.slane %v2073_v36, 2  ;;  %v2065_v45 = vrot.slane %v2064_v38, 4  ;;  %v2097_v48 = vmul.f32 %v2079_v41, %v2063_v39 }
 0x4e4   : > { %v2056_v46 = vadd.f32 %v2055_v40, %v2054_v35  ;;  %v2075_v29 = vadd.f32 %v2074_v44, %v2073_v36  ;;  %v2066_v47 = vadd.f32 %v2065_v45, %v2064_v38 }
 0x4e5   : > { %1900 = vxpose.xlu2.b32.start.end [1/1] (short) (narrow) %v1748_v33, 8 }
 0x4e6   : > { %v2096_v43 = vmul.f32 %v2079_v41, %v2056_v46  ;;  %v2067_v49 = vrot.slane %v2066_v47, 2  ;;  %v2076_v56 = vrot.slane %v2075_v29, 1 }
 0x4e8   : > { %v2104_v57 = vsel %vm1270_vm2, %v2097_v48, %v2096_v43  ;;  %v2068_v58 = vadd.f32 %v2067_v49, %v2066_v47  ;;  %v2077_v62 = vadd.f32 %v2076_v56, %v2075_v29  ;;  %v3685_v47 = vld [vmem:[%s4187_s12 + $0x28] sm:$0xff]  ;;  %v3686_v48 = vld [vmem:[%s4187_s12 + $0x30] sm:$0xff]  ;;  %v3687_v43 = vld [vmem:[%s4187_s12 + $0x38] sm:$0xff] }
 0x4ea   : > { %v2069_v61 = vrot.slane %v2068_v58, 1  ;;  %v2099_v8 = vmul.f32 %v2079_v41, %v2077_v62 }
 0x4ec   : > { %v2070_v63 = vadd.f32 %v2069_v61, %v2068_v58 }
 0x4ee   : > { %v2098_v31 = vmul.f32 %v2079_v41, %v2070_v63 }
 0x4f0   : > { %v2105_v20 = vsel %vm1272_vm3, %v2098_v31, %v2104_v57 }
 0x4f1   : > { %v4535_v25 = vsel %vm1274_vm4, %v2099_v8, %v2105_v20 }
 0x4f2   : > { %v4603_v49 = vsub.f32 %v4502_v0, %v4535_v25 }
 0x4f4   : > { %v2113_v56 = vperm.slane %v4603_v49, 0  ;;  %v2110_v63 = vrot.slane %v4603_v49, 1  ;;  %v2111_v31 = vrot.slane %v4603_v49, 2 }
 0x4f6   : > { %v2114_v8 = vperm.slane %v2110_v63, 0  ;;  %v2115_v20 = vperm.slane %v2111_v31, 0 }
 0x576   : > { %v1991_v21 = vpop.trf.xlu2 }
 0x579   : > { %v1841_v59 = vpop.trf.xlu1 }
 0x57a   : > { %3440 = vmatmul.msk.f32.vlgmr.msra.gmra.mxu2 %vm490_vm0, %v1841_v59  ;;  %3441 = vmatmul.msk.f32.vlgmr.msra.gmra.mxu3 %vm490_vm0, %v1841_v59 }
 0x57d   : > { %v1766_v1 = vpop.trf.xlu0 }
 0x57e   : > { %3438 = vmatmul.msk.f32.vlgmr.msra.gmra.mxu0 %vm490_vm0, %v1766_v1  ;;  %3439 = vmatmul.msk.f32.vlgmr.msra.gmra.mxu1 %vm490_vm0, %v1766_v1  ;;  %v1916_v3 = vpop.trf.xlu2 }
 0x582   : > { %3444 = vmatmul.msk.f32.vlgmr.msrb.gmra.mxu2 %vm490_vm0, %v1991_v21  ;;  %3445 = vmatmul.msk.f32.vlgmr.msrb.gmra.mxu3 %vm490_vm0, %v1991_v21 }
 0x586   : > { %3442 = vmatmul.msk.f32.vlgmr.msrb.gmra.mxu0 %vm490_vm0, %v1916_v3  ;;  %3443 = vmatmul.msk.f32.vlgmr.msrb.gmra.mxu1 %vm490_vm0, %v1916_v3 }
 0x5fb   : > { %v1802_v5 = vpop.f32.mrf.mxu0  ;;  %v1822_v12 = vpop.f32.mrf.mxu1 }
 0x5fc   : > { %v2080_v2 = vmul.f32 %v2079_v41, %v1802_v5  ;;  %v2081_v4 = vmul.f32 %v2079_v41, %v1822_v12 }
 0x5fd   : > { %v1877_v27 = vpop.f32.mrf.mxu2  ;;  %v1897_v28 = vpop.f32.mrf.mxu3 }
 0x5fe   : > { %v4546_v11 = vsub.f32 %v4433_v9, %v2080_v2  ;;  %v4549_v30 = vsub.f32 %v4436_v10, %v2081_v4  ;;  %v2082_v32 = vmul.f32 %v2079_v41, %v1877_v27  ;;  %v2083_v19 = vmul.f32 %v2079_v41, %v1897_v28 }
 0x5ff   : > { %v2112_v2 = vrot.slane %v4603_v49, 3 }
 0x600   : > { %v4552_v33 = vsub.f32 %v4407_v50, %v2082_v32  ;;  %v4555_v35 = vsub.f32 %v4410_v51, %v2083_v19  ;;  %2136 = vmatpush.xpose.msra.mxu0 %v4546_v11  ;;  %2156 = vmatpush.xpose.msra.mxu1 %v4549_v30 }
 0x601   : > { %v2116_v4 = vperm.slane %v2112_v2, 0 }
 0x602   : > { %2176 = vmatpush.xpose.msra.mxu2 %v4552_v33  ;;  %2196 = vmatpush.xpose.msra.mxu3 %v4555_v35 }
 0x603   : > { %v1952_v9 = vpop.f32.mrf.mxu0  ;;  %v1972_v36 = vpop.f32.mrf.mxu1  ;;  %2137 = vmatmul.f32.vlgmr.msra.gmra.mxu0 %v4451_v26  ;;  %2157 = vmatmul.f32.vlgmr.msra.gmra.mxu1 %v4454_v18 }
 0x604   : > { %v2084_v10 = vmul.f32 %v2079_v41, %v1952_v9  ;;  %v2085_v50 = vmul.f32 %v2079_v41, %v1972_v36 }
 0x605   : > { %v2027_v38 = vpop.f32.mrf.mxu2  ;;  %v2047_v39 = vpop.f32.mrf.mxu3  ;;  %2177 = vmatmul.f32.vlgmr.msra.gmra.mxu2 %v4415_v53  ;;  %2197 = vmatmul.f32.vlgmr.msra.gmra.mxu3 %v4418_v54 }
 0x606   : > { %v4566_v51 = vsub.f32 %v4465_v22, %v2084_v10  ;;  %v4569_v40 = vsub.f32 %v4468_v23, %v2085_v50  ;;  %v2086_v44 = vmul.f32 %v2079_v41, %v2027_v38  ;;  %v2087_v45 = vmul.f32 %v2079_v41, %v2047_v39  ;;  %v3682_v22 = vld [vmem:[%s4187_s12 + $0x10] sm:$0xff]  ;;  %v3683_v23 = vld [vmem:[%s4187_s12 + $0x18] sm:$0xff]  ;;  %v3684_v41 = vld [vmem:[%s4187_s12 + $0x20] sm:$0xff] }
 0x608   : > { %v4572_v46 = vsub.f32 %v4425_v7, %v2086_v44  ;;  %v4575_v29 = vsub.f32 %v4428_v55, %v2087_v45  ;;  %2216 = vmatpush.xpose.msrb.mxu0 %v4566_v51  ;;  %2236 = vmatpush.xpose.msrb.mxu1 %v4569_v40  ;;  %v3680_v7 = vld [vmem:[%s4187_s12] sm:$0xff]  ;;  %v3681_v55 = vld [vmem:[%s4187_s12 + $0x8] sm:$0xff]  ;;  %s3876_s12 = sshra.s32 %s3236_s14, 4  ;;  %s3877_s12 = int_to_ptr.hbm [resolvable:$true] %s3876_s12 }
 0x609   : > { %s3878_s29 = scalar_lea.hbm %s3877_s12, 32  ;;  %p3883_p3 = scmp.lt.s32.totalorder %s3877_s12, %s5045_s27 }
 0x60a   : > { %2256 = vmatpush.xpose.msrb.mxu2 %v4572_v46  ;;  %2276 = vmatpush.xpose.msrb.mxu3 %v4575_v29  ;;  %p3879_p6 = scmp.ne.s32.totalorder %s3877_s12, %s3878_s29  ;;  %p3884_p0 = scmp.lt.s32.totalorder %s3882_s10, %s3878_s29 }
 0x60b   : > { %2217 = vmatmul.f32.vlgmr.msrb.gmra.mxu0 %v4473_v24  ;;  %2237 = vmatmul.f32.vlgmr.msrb.gmra.mxu1 %v4476_v16 }
 0x60c   : > { %2381 = vmatpush.xpose.msra.mxu0 %v4546_v11  ;;  %2401 = vmatpush.xpose.msra.mxu1 %v4549_v30  ;;  %p3880_p7 = pnand %p3879_p6, %p4061_p11  ;;  %p3885_p5 = por %p3884_p0, %p3883_p3 }
 0x60d   : > { %2257 = vmatmul.f32.vlgmr.msrb.gmra.mxu2 %v4441_v15  ;;  %2277 = vmatmul.f32.vlgmr.msrb.gmra.mxu3 %v4444_v17 }
 0x60e   : > { %2421 = vmatpush.xpose.msra.mxu2 %v4552_v33  ;;  %2441 = vmatpush.xpose.msra.mxu3 %v4555_v35  ;;  %p3881_p8 = pneg %p3880_p7 }
 0x610   : > { %2461 = vmatpush.xpose.msrb.mxu0 %v4566_v51  ;;  %2481 = vmatpush.xpose.msrb.mxu1 %v4569_v40  ;;  %p3886_p9 = pnand %p3885_p5, %p3881_p8 }
 0x612   : > { %2501 = vmatpush.xpose.msrb.mxu2 %v4572_v46  ;;  %2521 = vmatpush.xpose.msrb.mxu3 %v4575_v29 }
 0x613   : > { %2382 = vmatmul.f32.vlgmr.msra.gmra.mxu0 %v3680_v7  ;;  %2402 = vmatmul.f32.vlgmr.msra.gmra.mxu1 %v3681_v55 }
 0x614   : > { %2628 = vmatpush.msra.mxu0 %v3680_v7  ;;  %2648 = vmatpush.msra.mxu1 %v3681_v55 }
 0x615   : > { %2422 = vmatmul.f32.vlgmr.msra.gmra.mxu2 %v3682_v22  ;;  %2442 = vmatmul.f32.vlgmr.msra.gmra.mxu3 %v3683_v23 }
 0x616   : > { %2703 = vmatpush.msra.mxu2 %v3682_v22  ;;  %2723 = vmatpush.msra.mxu3 %v3683_v23 }
 0x61b   : > { %2462 = vmatmul.f32.vlgmr.msrb.gmra.mxu0 %v3684_v41  ;;  %2482 = vmatmul.f32.vlgmr.msrb.gmra.mxu1 %v3685_v47 }
 0x61c   : > { %2778 = vmatpush.msrb.mxu0 %v3684_v41  ;;  %2798 = vmatpush.msrb.mxu1 %v3685_v47 }
 0x61d   : > { %2502 = vmatmul.f32.vlgmr.msrb.gmra.mxu2 %v3686_v48  ;;  %2522 = vmatmul.f32.vlgmr.msrb.gmra.mxu3 %v3687_v43 }
 0x61e   : > { %2853 = vmatpush.msrb.mxu2 %v3686_v48  ;;  %2873 = vmatpush.msrb.mxu3 %v3687_v43 }
 0x680   : > { %v2138_v57 = vpop.f32.mrf.mxu0  ;;  %v2158_v58 = vpop.f32.mrf.mxu1 }
 0x681   : > { %v2139_v61 = vadd.f32 %v2138_v57, %v2113_v56 }
 0x683   : > { %v4606_v62 = vadd.f32 %v2158_v58, %v2139_v61 }
 0x688   : > { %v2178_v59 = vpop.f32.mrf.mxu2  ;;  %v2218_v21 = vpop.f32.mrf.mxu0 }
 0x689   : > { %v2179_v1 = vadd.f32 %v2178_v59, %v2114_v8  ;;  %v2219_v3 = vadd.f32 %v2218_v21, %v2115_v20  ;;  %v2198_v5 = vpop.f32.mrf.mxu3  ;;  %v2238_v0 = vpop.f32.mrf.mxu1 }
 0x68b   : > { %v4610_v25 = vadd.f32 %v2198_v5, %v2179_v1  ;;  %v4612_v12 = vadd.f32 %v2238_v0, %v2219_v3 }
 0x690   : > { %v2383_v27 = vpop.f32.mrf.mxu0  ;;  %v2258_v28 = vpop.f32.mrf.mxu2 }
 0x691   : > { %v2384_v32 = vadd.f32 %v2383_v27, %v2113_v56  ;;  %v2278_v19 = vpop.f32.mrf.mxu3  ;;  %v2259_v9 = vadd.f32 %v2258_v28, %v2116_v4  ;;  %v2403_v36 = vpop.f32.mrf.mxu1 }
 0x693   : > { %v2404_v10 = vadd.f32 %v2403_v36, %v2384_v32  ;;  %v4615_v50 = vadd.f32 %v2278_v19, %v2259_v9 }
 0x695   : > { %v2526_v38 = vsel %vm490_vm0, %v2404_v10, -inf }
 0x696   : > { %2527 = vmax.xlane.f32.xlu1 %v2526_v38 }
 0x698   : > { %v2463_v39 = vpop.f32.mrf.mxu0  ;;  %v2423_v44 = vpop.f32.mrf.mxu2 }
 0x699   : > { %v2464_v45 = vadd.f32 %v2463_v39, %v2115_v20  ;;  %v2443_v7 = vpop.f32.mrf.mxu3  ;;  %v2424_v55 = vadd.f32 %v2423_v44, %v2114_v8  ;;  %v2483_v22 = vpop.f32.mrf.mxu1 }
 0x69b   : > { %v2484_v23 = vadd.f32 %v2483_v22, %v2464_v45  ;;  %v2444_v41 = vadd.f32 %v2443_v7, %v2424_v55 }
 0x69d   : > { %v2532_v47 = vsel %vm490_vm0, %v2484_v23, -inf  ;;  %v2529_v48 = vsel %vm490_vm0, %v2444_v41, -inf }
 0x69e   : > { %2533 = vmax.xlane.f32.xlu1 %v2532_v47  ;;  %2530 = vmax.xlane.f32.xlu0 %v2529_v48 }
 0x6a0   : > { %v2503_v43 = vpop.f32.mrf.mxu2 }
 0x6a1   : > { %v2523_v56 = vpop.f32.mrf.mxu3  ;;  %v2504_v57 = vadd.f32 %v2503_v43, %v2116_v4 }
 0x6a3   : > { %v2524_v58 = vadd.f32 %v2523_v56, %v2504_v57 }
 0x6a5   : > { %v2535_v61 = vsel %vm490_vm0, %v2524_v58, -inf }
 0x6a6   : > { %2536 = vmax.xlane.f32.xlu2 %v2535_v61 }
 0x709   : > { %v2528_v63 = vpop.xlane.xlu1 %2527 }
 0x70a   : > { %v2538_v31 = vsub.f32 %v2404_v10, %v2528_v63 }
 0x70c   : > { %v2542_v20 = vmul.f32 1.442695, %v2538_v31 }
 0x70e   : > { %3600 = vpow2.f32 %v2542_v20 }
 0x711   : > { %v2534_v8 = vpop.xlane.xlu1 %2533  ;;  %v2531_v59 = vpop.xlane.xlu0 %2530 }
 0x712   : > { %v2539_v21 = vsub.f32 %v2444_v41, %v2531_v59  ;;  %v2540_v3 = vsub.f32 %v2484_v23, %v2534_v8 }
 0x714   : > { %v3601_v1 = vpop.eup %3600  ;;  %v2544_v5 = vmul.f32 1.442695, %v2539_v21  ;;  %v2546_v2 = vmul.f32 1.442695, %v2540_v3 }
 0x715   : > { %v2550_v0 = vsel %vm490_vm0, %v3601_v1, 0.0 }
 0x716   : > { %2551 = vadd.xlane.f32.xlu2 %v2550_v0  ;;  %3602 = vpow2.f32 %v2544_v5 }
 0x717   : > { %3604 = vpow2.f32 %v2546_v2 }
 0x719   : > { %v2537_v4 = vpop.xlane.xlu2 %2536 }
 0x71a   : > { %v2541_v27 = vsub.f32 %v2524_v58, %v2537_v4 }
 0x71c   : > { %v3603_v28 = vpop.eup %3602  ;;  %v2548_v32 = vmul.f32 1.442695, %v2541_v27 }
 0x71d   : > { %v2553_v19 = vsel %vm490_vm0, %v3603_v28, 0.0  ;;  %v3605_v9 = vpop.eup %3604 }
 0x71e   : > { %3606 = vpow2.f32 %v2548_v32  ;;  %2554 = vadd.xlane.f32.xlu0 %v2553_v19  ;;  %v2556_v38 = vsel %vm490_vm0, %v3605_v9, 0.0 }
 0x724   : > { %v3607_v36 = vpop.eup %3606 }
 0x725   : > { %v2559_v10 = vsel %vm490_vm0, %v3607_v36, 0.0 }
 0x726   : > { %2560 = vadd.xlane.f32.xlu1 %v2559_v10  ;;  %2557 = vadd.xlane.f32.xlu0 %v2556_v38 }
 0x789   : > { %v2552_v39 = vpop.xlane.xlu2 %2551 }
 0x78a   : > { %3608 = vrcp.f32 %v2552_v39 }
 0x790   : > { %v3609_v44 = vpop.eup %3608 }
 0x791   : > { %v2566_v45 = vmul.f32 %v3609_v44, %v3601_v1  ;;  %v2555_v7 = vpop.xlane.xlu0 %2554 }
 0x792   : > { %3610 = vrcp.f32 %v2555_v7 }
 0x793   : > { %v2570_v55 = vsub.f32 %v2566_v45, %v4372_v52 }
 0x795   : > { %v2574_v22 = vmul.f32 0.125, %v2570_v55 }
 0x797   : > { %v2878_v23 = vsel %vm490_vm0, %v2574_v22, 0.0  ;;  %2578 = vxpose.xlu0.b32.start.end [1/1] (short) (narrow) %v2574_v22, 8 }
 0x798   : > { %v2879_v41 = vrot.slane %v2878_v23, 4  ;;  %v3611_v47 = vpop.eup %3610 }
 0x799   : > { %v2561_v43 = vpop.xlane.xlu1 %2560  ;;  %v2558_v56 = vpop.xlane.xlu0 %2557  ;;  %v2567_v57 = vmul.f32 %v3611_v47, %v3603_v28 }
 0x79a   : > { %v2880_v48 = vadd.f32 %v2879_v41, %v2878_v23  ;;  %3612 = vrcp.f32 %v2561_v43 }
 0x79b   : > { %3614 = vrcp.f32 %v2558_v56  ;;  %v2571_v58 = vsub.f32 %v2567_v57, %v4339_v6 }
 0x79c   : > { %v2881_v61 = vrot.slane %v2880_v48, 2 }
 0x79d   : > { %v2575_v63 = vmul.f32 0.125, %v2571_v58 }
 0x79e   : > { %v2882_v20 = vadd.f32 %v2881_v61, %v2880_v48 }
 0x79f   : > { %2653 = vxpose.xlu1.b32.start.end [1/1] (short) (narrow) %v2575_v63, 8  ;;  %v2885_v31 = vsel %vm490_vm0, %v2575_v63, 0.0 }
 0x7a0   : > { %v3613_v52 = vpop.eup %3612  ;;  %v2886_v8 = vrot.slane %v2885_v31, 4  ;;  %v2883_v0 = vrot.slane %v2882_v20, 1 }
 0x7a1   : > { %v3615_v59 = vpop.eup %3614  ;;  %v2569_v21 = vmul.f32 %v3613_v52, %v3607_v36  ;;  %v4633_v36 = vstv %s3456_s21  ;;  %v4645_v52 = vld [vmem:[%s4207_s24 + $0x10] sm:$0xff] }
 0x7a2   : > { %v2887_v1 = vadd.f32 %v2886_v8, %v2885_v31  ;;  %v2568_v3 = vmul.f32 %v3615_v59, %v3605_v9  ;;  %v2884_v19 = vadd.f32 %v2883_v0, %v2882_v20  ;;  %v597_v20 = vsel %vm490_vm0, %v4645_v52, -inf  ;;  %v4650_v8 = vld [vmem:[%s4207_s24 + $0x18] sm:$0xff]  ;;  %v4653_v59 = vld [vmem:[%s4207_s24] sm:$0xff] }
 0x7a3   : > { %v2573_v5 = vsub.f32 %v2569_v21, %v4357_v34  ;;  %v600_v21 = vsel %vm490_vm0, %v4650_v8, -inf  ;;  %v1456_v0 = vsel %vm490_vm0, %v4514_v42, -inf }
 0x7a4   : > { %v2888_v2 = vrot.slane %v2887_v1, 2  ;;  %v2572_v4 = vsub.f32 %v2568_v3, %v4379_v60  ;;  %v2924_v7 = vmul.f32 %v4633_v36, %v2884_v19  ;;  %v1453_v3 = vsel %vm490_vm0, %v4505_v14, -inf }
 0x7a5   : > { %v2577_v6 = vmul.f32 0.125, %v2573_v5  ;;  %v1450_v5 = vsel %vm490_vm0, %v4509_v13, -inf  ;;  %v2287_v19 = vsel %vm490_vm0, %v4612_v12, -inf }
 0x7a6   : > { %v2889_v27 = vadd.f32 %v2888_v2, %v2887_v1  ;;  %v2576_v28 = vmul.f32 0.125, %v2572_v4  ;;  %v591_v1 = vsel %vm490_vm0, %v4653_v59, -inf  ;;  %v2284_v2 = vsel %vm490_vm0, %v4610_v25, -inf  ;;  %v4668_v4 = vld [vmem:[%s4207_s24 + $0x8] sm:$0xff] }
 0x7a7   : > { %2803 = vxpose.xlu2.b32.start.end [1/1] (short) (narrow) %v2577_v6, 8  ;;  %v2899_v32 = vsel %vm490_vm0, %v2577_v6, 0.0  ;;  %v594_v6 = vsel %vm490_vm0, %v4668_v4, -inf }
 0x7a8   : > { %v2890_v10 = vrot.slane %v2889_v27, 1  ;;  %v2900_v38 = vrot.slane %v2899_v32, 4  ;;  %v2892_v39 = vsel %vm490_vm0, %v2576_v28, 0.0 }
 0x7a9   : > { %v2893_v9 = vrot.slane %v2892_v39, 4 }
 0x7aa   : > { %v2891_v44 = vadd.f32 %v2890_v10, %v2889_v27  ;;  %v2901_v34 = vadd.f32 %v2900_v38, %v2899_v32  ;;  %v2290_v27 = vsel %vm490_vm0, %v4615_v50, -inf  ;;  %v2281_v32 = vsel %vm490_vm0, %v4606_v62, -inf }
 0x7ab   : > { %v2894_v45 = vadd.f32 %v2893_v9, %v2892_v39 }
 0x7ac   : > { %v2925_v60 = vmul.f32 %v4633_v36, %v2891_v44  ;;  %v2902_v55 = vrot.slane %v2901_v34, 2 }
 0x7ad   : > { %v2895_v22 = vrot.slane %v2894_v45, 2 }
 0x7ae   : > { %v2903_v23 = vadd.f32 %v2902_v55, %v2901_v34  ;;  %v2932_v41 = vsel %vm1270_vm2, %v2925_v60, %v2924_v7 }
 0x7af   : > { %2728 = vxpose.xlu2.b32.start.end [1/1] (short) (narrow) %v2576_v28, 8  ;;  %v2896_v47 = vadd.f32 %v2895_v22, %v2894_v45  ;;  %v1459_v28 = vsel %vm490_vm0, %v4512_v37, -inf }
 0x7b0   : > { %v2904_v48 = vrot.slane %v2903_v23, 1 }
 0x7b1   : > { %v2897_v43 = vrot.slane %v2896_v47, 1 }
 0x7b2   : > { %v2905_v56 = vadd.f32 %v2904_v48, %v2903_v23 }
 0x7b3   : > { %v2898_v57 = vadd.f32 %v2897_v43, %v2896_v47 }
 0x7b4   : > { %v2927_v58 = vmul.f32 %v4633_v36, %v2905_v56 }
 0x7b5   : > { %v2926_v61 = vmul.f32 %v4633_v36, %v2898_v57 }
 0x7b7   : > { %v2933_v63 = vsel %vm1272_vm3, %v2926_v61, %v2932_v41 }
 0x7b8   : > { %v4642_v31 = vsel %vm1274_vm4, %v2927_v58, %v2933_v63 }
 0x7ff   : > { %598 = vmax.xlane.f32.xlu1 %v597_v20 }
 0x807   : > { %601 = vmax.xlane.f32.xlu1 %v600_v21 }
 0x808   : > { %592 = vmax.xlane.f32.xlu0 %v591_v1 }
 0x80f   : > { %1454 = vmax.xlane.f32.xlu1 %v1453_v3 }
 0x810   : > { %1451 = vmax.xlane.f32.xlu0 %v1450_v5 }
 0x817   : > { %1457 = vmax.xlane.f32.xlu1 %v1456_v0 }
 0x818   : > { %2285 = vmax.xlane.f32.xlu0 %v2284_v2 }
 0x81f   : > { %2291 = vmax.xlane.f32.xlu1 %v2290_v27 }
 0x820   : > { %1460 = vmax.xlane.f32.xlu0 %v1459_v28  ;;  %595 = vmax.xlane.f32.xlu2 %v594_v6 }
 0x828   : > { %2282 = vmax.xlane.f32.xlu2 %v2281_v32 }
 0x830   : > { %2288 = vmax.xlane.f32.xlu2 %v2287_v19 }
 0x83b   : > { %v2594_v10 = vpop.trf.xlu0 }
 0x83c   : > { %3448 = vmatmul.msk.f32.vlgmr.msra.gmra.mxu0 %vm490_vm0, %v2594_v10  ;;  %3449 = vmatmul.msk.f32.vlgmr.msra.gmra.mxu1 %vm490_vm0, %v2594_v10 }
 0x840   : > { %v2819_v38 = vpop.trf.xlu2 }
 0x843   : > { %v2669_v39 = vpop.trf.xlu1 }
 0x844   : > { %3450 = vmatmul.msk.f32.vlgmr.msra.gmra.mxu2 %vm490_vm0, %v2669_v39  ;;  %3451 = vmatmul.msk.f32.vlgmr.msra.gmra.mxu3 %vm490_vm0, %v2669_v39 }
 0x848   : > { %v2744_v9 = vpop.trf.xlu2 }
 0x849   : > { %3452 = vmatmul.msk.f32.vlgmr.msrb.gmra.mxu0 %vm490_vm0, %v2744_v9  ;;  %3453 = vmatmul.msk.f32.vlgmr.msrb.gmra.mxu1 %vm490_vm0, %v2744_v9 }
 0x84c   : > { %3454 = vmatmul.msk.f32.vlgmr.msrb.gmra.mxu2 %vm490_vm0, %v2819_v38  ;;  %3455 = vmatmul.msk.f32.vlgmr.msrb.gmra.mxu3 %vm490_vm0, %v2819_v38 }
 0x8b9   : > { %v2630_v44 = vpop.f32.mrf.mxu0  ;;  %v2650_v34 = vpop.f32.mrf.mxu1 }
 0x8ba   : > { %v2908_v45 = vmul.f32 %v4633_v36, %v2630_v44  ;;  %v2909_v7 = vmul.f32 %v4633_v36, %v2650_v34 }
 0x8bc   : > { %v2916_v60 = vsub.f32 %v4546_v11, %v2908_v45  ;;  %v2917_v55 = vsub.f32 %v4549_v30, %v2909_v7 }
 0x8be   : > { %2964 = vmatpush.xpose.msra.mxu0 %v2916_v60  ;;  %2984 = vmatpush.xpose.msra.mxu1 %v2917_v55 }
 0x8c1   : > { %2965 = vmatmul.f32.vlgmr.msra.gmra.mxu0 %v4451_v26  ;;  %2985 = vmatmul.f32.vlgmr.msra.gmra.mxu1 %v4454_v18 }
 0x8c6   : > { %v2780_v22 = vpop.f32.mrf.mxu0  ;;  %v2800_v23 = vpop.f32.mrf.mxu1 }
 0x8c7   : > { %v2912_v41 = vmul.f32 %v4633_v36, %v2780_v22  ;;  %v2913_v47 = vmul.f32 %v4633_v36, %v2800_v23  ;;  %v2705_v48 = vpop.f32.mrf.mxu2  ;;  %v2725_v43 = vpop.f32.mrf.mxu3 }
 0x8c8   : > { %v2910_v56 = vmul.f32 %v4633_v36, %v2705_v48  ;;  %v2911_v11 = vmul.f32 %v4633_v36, %v2725_v43 }
 0x8c9   : > { %v2920_v30 = vsub.f32 %v4566_v51, %v2912_v41  ;;  %v2921_v57 = vsub.f32 %v4569_v40, %v2913_v47 }
 0x8ca   : > { %v2918_v26 = vsub.f32 %v4552_v33, %v2910_v56  ;;  %v2919_v18 = vsub.f32 %v4555_v35, %v2911_v11 }
 0x8cb   : > { %3044 = vmatpush.xpose.msrb.mxu0 %v2920_v30  ;;  %3064 = vmatpush.xpose.msrb.mxu1 %v2921_v57 }
 0x8cc   : > { %3004 = vmatpush.xpose.msra.mxu2 %v2918_v26  ;;  %3024 = vmatpush.xpose.msra.mxu3 %v2919_v18 }
 0x8ce   : > { %3045 = vmatmul.f32.vlgmr.msrb.gmra.mxu0 %v4473_v24  ;;  %3065 = vmatmul.f32.vlgmr.msrb.gmra.mxu1 %v4476_v16  ;;  %v593_v24 = vpop.xlane.xlu0 %592 }
 0x8cf   : > { %v2855_v58 = vpop.f32.mrf.mxu2  ;;  %v2875_v61 = vpop.f32.mrf.mxu3  ;;  %3005 = vmatmul.f32.vlgmr.msra.gmra.mxu2 %v4415_v53  ;;  %3025 = vmatmul.f32.vlgmr.msra.gmra.mxu3 %v4418_v54  ;;  %v2936_v53 = vsub.f32 %v4603_v49, %v4642_v31  ;;  %v603_v0 = vsub.f32 %v4653_v59, %v593_v24 }
 0x8d0   : > { %v2914_v51 = vmul.f32 %v4633_v36, %v2855_v58  ;;  %v2915_v33 = vmul.f32 %v4633_v36, %v2875_v61 }
 0x8d1   : > { %v2941_v54 = vperm.slane %v2936_v53, 0  ;;  %v2939_v49 = vrot.slane %v2936_v53, 2  ;;  %v2938_v27 = vrot.slane %v2936_v53, 1  ;;  %v607_v19 = vmul.f32 1.442695, %v603_v0 }
 0x8d2   : > { %v2922_v35 = vsub.f32 %v4572_v46, %v2914_v51  ;;  %v2923_v40 = vsub.f32 %v4575_v29, %v2915_v33  ;;  %v596_v46 = vpop.xlane.xlu2 %595  ;;  %v2940_v60 = vrot.slane %v2936_v53, 3 }
 0x8d3   : > { %v604_v29 = vsub.f32 %v4668_v4, %v596_v46  ;;  %v2943_v1 = vperm.slane %v2939_v49, 0  ;;  %v2942_v38 = vperm.slane %v2938_v27, 0 }
 0x8d4   : > { %3084 = vmatpush.xpose.msrb.mxu2 %v2922_v35  ;;  %3104 = vmatpush.xpose.msrb.mxu3 %v2923_v40  ;;  %v2944_v48 = vperm.slane %v2940_v60, 0 }
 0x8d5   : > { %v609_v31 = vmul.f32 1.442695, %v604_v29 }
 0x8d6   : > { %v1452_v36 = vpop.xlane.xlu0 %1451 }
 0x8d7   : > { %3085 = vmatmul.f32.vlgmr.msrb.gmra.mxu2 %v4441_v15  ;;  %3105 = vmatmul.f32.vlgmr.msrb.gmra.mxu3 %v4444_v17  ;;  %v599_v17 = vpop.xlane.xlu1 %598  ;;  %3616 = vpow2.f32 %v609_v31  ;;  %v4729_v32 = vsub.f32 %v4509_v13, %v1452_v36 }
 0x8d8   : > { %v605_v44 = vsub.f32 %v4645_v52, %v599_v17  ;;  %3618 = vpow2.f32 %v607_v19 }
 0x8d9   : > { %v1466_v13 = vmul.f32 1.442695, %v4729_v32 }
 0x8da   : > { %v611_v22 = vmul.f32 1.442695, %v605_v44  ;;  %v2283_v47 = vpop.xlane.xlu2 %2282 }
 0x8db   : > { %3620 = vpow2.f32 %v1466_v13  ;;  %v4764_v51 = vsub.f32 %v4606_v62, %v2283_v47 }
 0x8dc   : > { %3622 = vpow2.f32 %v611_v22 }
 0x8dd   : > { %v4736_v9 = vpop.eup %3616 }
 0x8de   : > { %v2286_v10 = vpop.xlane.xlu0 %2285  ;;  %v618_v55 = vsel %vm490_vm0, %v4736_v9, 0.0  ;;  %v4753_v43 = vpop.eup %3618 }
 0x8df   : > { %v602_v6 = vpop.xlane.xlu1 %601  ;;  %v4746_v41 = vsub.f32 %v4610_v25, %v2286_v10  ;;  %v615_v61 = vsel %vm490_vm0, %v4753_v43, 0.0 }
 0x8e0   : > { %v606_v45 = vsub.f32 %v4650_v8, %v602_v6 }
 0x8e1   : > { %v2299_v25 = vmul.f32 1.442695, %v4746_v41  ;;  %v3621_v26 = vpop.eup %3620 }
 0x8e2   : > { %v613_v8 = vmul.f32 1.442695, %v606_v45  ;;  %v4775_v40 = vpop.eup %3622 }
 0x8e4   : > { %3624 = vpow2.f32 %v613_v8 }
 0x8e5   : > { %3626 = vpow2.f32 %v2299_v25 }
 0x8e6   : > { %v1461_v57 = vpop.xlane.xlu0 %1460 }
 0x8e7   : > { %v1455_v23 = vpop.xlane.xlu1 %1454  ;;  %v4767_v33 = vsub.f32 %v4512_v37, %v1461_v57  ;;  %v2297_v37 = vmul.f32 1.442695, %v4764_v51 }
 0x8e8   : > { %v4757_v18 = vsub.f32 %v4505_v14, %v1455_v23  ;;  %v1474_v14 = vsel %vm490_vm0, %v3621_v26, 0.0 }
 0x8ea   : > { %v1468_v53 = vmul.f32 1.442695, %v4757_v18  ;;  %v4778_v24 = vpop.eup %3624 }
 0x8eb   : > { %v624_v17 = vsel %vm490_vm0, %v4778_v24, 0.0 }
 0x8ec   : > { %3628 = vpow2.f32 %v1468_v53 }
 0x8ed   : > { %3630 = vpow2.f32 %v2297_v37 }
 0x8ef   : > { %v1458_v62 = vpop.xlane.xlu1 %1457 }
 0x8f7   : > { %v2292_v31 = vpop.xlane.xlu1 %2291 }
 0x93e   : > { %v2966_v16 = vpop.f32.mrf.mxu0  ;;  %v2986_v63 = vpop.f32.mrf.mxu1 }
 0x93f   : > { %v2967_v20 = vadd.f32 %v2966_v16, %v2941_v54  ;;  %v1472_v54 = vmul.f32 1.442695, %v4767_v33  ;;  %v2289_v16 = vpop.xlane.xlu2 %2288 }
 0x940   : > { %v4790_v46 = vsub.f32 %v4612_v12, %v2289_v16 }
 0x941   : > { %v4714_v21 = vadd.f32 %v2986_v63, %v2967_v20  ;;  %v3627_v63 = vpop.eup %3626  ;;  %v4783_v20 = vsub.f32 %v4514_v42, %v1458_v62  ;;  %3632 = vpow2.f32 %v1472_v54 }
 0x942   : > { %v2308_v29 = vsel %vm490_vm0, %v3627_v63, 0.0  ;;  %v2301_v42 = vmul.f32 1.442695, %v4790_v46  ;;  %v3629_v36 = vpop.eup %3628 }
 0x943   : > { %3194 = vst.msk [vmem:[%s4717_s22] sm:$0xff] %vm490_vm0, %v4714_v21  ;;  %v3109_v15 = vsel %vm490_vm0, %v4714_v21, -inf  ;;  %v1470_v49 = vmul.f32 1.442695, %v4783_v20  ;;  %v1477_v12 = vsel %vm490_vm0, %v3629_v36, 0.0 }
 0x944   : > { %3110 = vmax.xlane.f32.xlu2 %v3109_v15  ;;  %v621_v15 = vsel %vm490_vm0, %v4775_v40, 0.0 }
 0x945   : > { %3634 = vpow2.f32 %v1470_v49 }
 0x946   : > { %3636 = vpow2.f32 %v2301_v42 }
 0x94b   : > { %v3046_v3 = vpop.f32.mrf.mxu0  ;;  %v3066_v5 = vpop.f32.mrf.mxu1 }
 0x94c   : > { %v3047_v2 = vadd.f32 %v3046_v3, %v2943_v1  ;;  %v3631_v1 = vpop.eup %3630 }
 0x94d   : > { %v3633_v3 = vpop.eup %3632  ;;  %v2305_v0 = vsel %vm490_vm0, %v3631_v1, 0.0 }
 0x94e   : > { %v4726_v28 = vadd.f32 %v3066_v5, %v3047_v2  ;;  %v4796_v5 = vsub.f32 %v4615_v50, %v2292_v31  ;;  %v1483_v2 = vsel %vm490_vm0, %v3633_v3, 0.0  ;;  %v3635_v27 = vpop.eup %3634 }
 0x94f   : > { %v3637_v19 = vpop.eup %3636 }
 0x950   : > { %3196 = vst.msk [vmem:[%s4717_s22 + $0x10] sm:$0xff] %vm490_vm0, %v4726_v28  ;;  %v3115_v4 = vsel %vm490_vm0, %v4726_v28, -inf  ;;  %v2303_v6 = vmul.f32 1.442695, %v4796_v5  ;;  %v2311_v50 = vsel %vm490_vm0, %v3637_v19, 0.0 }
 0x951   : > { %3116 = vmax.xlane.f32.xlu1 %v3115_v4  ;;  %v1480_v4 = vsel %vm490_vm0, %v3635_v27, 0.0 }
 0x952   : > { %v3006_v59 = vpop.f32.mrf.mxu2  ;;  %v3026_v39 = vpop.f32.mrf.mxu3  ;;  %3638 = vpow2.f32 %v2303_v6 }
 0x953   : > { %v3007_v34 = vadd.f32 %v3006_v59, %v2942_v38 }
 0x955   : > { %v4741_v7 = vadd.f32 %v3026_v39, %v3007_v34 }
 0x957   : > { %3195 = vst.msk [vmem:[%s4717_s22 + $0x8] sm:$0xff] %vm490_vm0, %v4741_v7  ;;  %v3112_v52 = vsel %vm490_vm0, %v4741_v7, -inf }
 0x958   : > { %3113 = vmax.xlane.f32.xlu0 %v3112_v52  ;;  %v3639_v10 = vpop.eup %3638 }
 0x959   : > { %619 = vadd.xlane.f32.xlu1 %v618_v55  ;;  %v2314_v38 = vsel %vm490_vm0, %v3639_v10, 0.0 }
 0x95a   : > { %v3086_v56 = vpop.f32.mrf.mxu2  ;;  %v3106_v11 = vpop.f32.mrf.mxu3 }
 0x95b   : > { %v3087_v30 = vadd.f32 %v3086_v56, %v2944_v48 }
 0x95d   : > { %v4759_v58 = vadd.f32 %v3106_v11, %v3087_v30 }
 0x95f   : > { %3197 = vst.msk [vmem:[%s4717_s22 + $0x18] sm:$0xff] %vm490_vm0, %v4759_v58  ;;  %v3118_v35 = vsel %vm490_vm0, %v4759_v58, -inf }
 0x960   : > { %3119 = vmax.xlane.f32.xlu2 %v3118_v35  ;;  %616 = vadd.xlane.f32.xlu0 %v615_v61 }
 0x961   : > { %1475 = vadd.xlane.f32.xlu1 %v1474_v14 }
 0x968   : > { %622 = vadd.xlane.f32.xlu2 %v621_v15  ;;  %625 = vadd.xlane.f32.xlu0 %v624_v17 }
 0x969   : > { %2309 = vadd.xlane.f32.xlu1 %v2308_v29 }
 0x970   : > { %1478 = vadd.xlane.f32.xlu2 %v1477_v12  ;;  %2306 = vadd.xlane.f32.xlu0 %v2305_v0 }
 0x971   : > { %1484 = vadd.xlane.f32.xlu1 %v1483_v2 }
 0x978   : > { %1481 = vadd.xlane.f32.xlu2 %v1480_v4  ;;  %2312 = vadd.xlane.f32.xlu0 %v2311_v50 }
 0x980   : > { %2315 = vadd.xlane.f32.xlu2 %v2314_v38 }
 0x9b7   : > { %v3111_v59 = vpop.xlane.xlu2 %3110 }
 0x9b8   : > { %v4806_v39 = vsub.f32 %v4714_v21, %v3111_v59 }
 0x9ba   : > { %v3125_v44 = vmul.f32 1.442695, %v4806_v39 }
 0x9bc   : > { %3640 = vpow2.f32 %v3125_v44 }
 0x9c2   : > { %v3641_v13 = vpop.eup %3640 }
 0x9c3   : > { %v3133_v34 = vsel %vm490_vm0, %v3641_v13, 0.0 }
 0x9c4   : > { %3134 = vadd.xlane.f32.xlu0 %v3133_v34  ;;  %v3117_v45 = vpop.xlane.xlu1 %3116 }
 0x9c5   : > { %v4811_v60 = vsub.f32 %v4726_v28, %v3117_v45 }
 0x9c7   : > { %v3129_v55 = vmul.f32 1.442695, %v4811_v60 }
 0x9c9   : > { %3642 = vpow2.f32 %v3129_v55 }
 0x9cb   : > { %v3114_v22 = vpop.xlane.xlu0 %3113 }
 0x9cc   : > { %v4815_v23 = vsub.f32 %v4741_v7, %v3114_v22  ;;  %v620_v21 = vpop.xlane.xlu1 %619 }
 0x9cd   : > { %3644 = vrcp.f32 %v620_v21  ;;  %vm646_vm7 = vweird.f32 %v620_v21  ;;  %v650_v29 = vand.u32 2147483647, %v620_v21  ;;  %v652_v49 = vand.u32 2147483648, %v620_v21 }
 0x9ce   : > { %v3127_v52 = vmul.f32 1.442695, %v4815_v23 }
 0x9cf   : > { %v3643_v8 = vpop.eup %3642  ;;  %vm4849_vm12 = vcmp.eq.f32.partialorder %v650_v29, 8.507059e+37  ;;  %v653_v4 = vor.u32 1.1754944e-38, %v652_v49 }
 0x9d0   : > { %3646 = vpow2.f32 %v3127_v52  ;;  %v3139_v47 = vsel %vm490_vm0, %v3643_v8, 0.0 }
 0x9d1   : > { %3140 = vadd.xlane.f32.xlu2 %v3139_v47 }
 0x9d3   : > { %v4819_v48 = vpop.eup %3644  ;;  %v3120_v28 = vpop.xlane.xlu2 %3119 }
 0x9d4   : > { %v617_v56 = vpop.xlane.xlu0 %616  ;;  %v4822_v11 = vsub.f32 %v4759_v58, %v3120_v28  ;;  %v1476_v25 = vpop.xlane.xlu1 %1475  ;;  %v642_v7 = vmul.f32 %v4819_v48, %v620_v21  ;;  %vm647_vm8 = vweird.f32 %v4819_v48 }
 0x9d5   : > { %3648 = vrcp.f32 %v617_v56  ;;  %vm632_vm5 = vweird.f32 %v617_v56  ;;  %v636_v58 = vand.u32 2147483647, %v617_v56  ;;  %v638_v37 = vand.u32 2147483648, %v617_v56  ;;  %vm4845_vm11 = vmor %vm646_vm7, %vm647_vm8 }
 0x9d6   : > { %v3647_v30 = vpop.eup %3646  ;;  %v3131_v57 = vmul.f32 1.442695, %v4822_v11  ;;  %3650 = vlog2.f32 %v1476_v25  ;;  %v643_v61 = vsub.f32 1.0, %v642_v7 }
 0x9d7   : > { %v3136_v26 = vsel %vm490_vm0, %v3647_v30, 0.0  ;;  %v639_v1 = vor.u32 1.1754944e-38, %v638_v37  ;;  %vm637_vm10 = vcmp.eq.f32.partialorder %v636_v58, 8.507059e+37 }
 0x9d8   : > { %3652 = vpow2.f32 %v3131_v57  ;;  %3137 = vadd.xlane.f32.xlu1 %v3136_v26  ;;  %v644_v63 = vmul.f32 %v4819_v48, %v643_v61 }
 0x9da   : > { %v645_v12 = vadd.f32 %v4819_v48, %v644_v63 }
 0x9db   : > { %v3649_v35 = vpop.eup %3648  ;;  %v4827_v53 = vpop.xlane.xlu2 %622 }
 0x9dc   : > { %v628_v14 = vmul.f32 %v3649_v35, %v617_v56  ;;  %v4829_v62 = vpop.xlane.xlu0 %625  ;;  %3654 = vrcp.f32 %v4827_v53  ;;  %v2310_v54 = vpop.xlane.xlu1 %2309  ;;  %vm633_vm6 = vweird.f32 %v3649_v35  ;;  %v649_v52 = vsel %vm4845_vm11, %v4819_v48, %v645_v12 }
 0x9dd   : > { %v3651_v16 = vpop.eup %3650  ;;  %3656 = vrcp.f32 %v4829_v62  ;;  %vm4837_vm9 = vmor %vm632_vm5, %vm633_vm6  ;;  %vm674_vm13 = vweird.f32 %v4829_v62  ;;  %v680_v28 = vand.u32 2147483648, %v4829_v62  ;;  %v654_v7 = vsel %vm4849_vm12, %v653_v4, %v649_v52 }
 0x9de   : > { %v629_v15 = vsub.f32 1.0, %v628_v14  ;;  %v3653_v17 = vpop.eup %3652  ;;  %3658 = vlog2.f32 %v2310_v54  ;;  %v1487_v3 = vmul.f32 0.6931472, %v3651_v16  ;;  %vm660_vm15 = vweird.f32 %v4827_v53 }
 0x9df   : > { %v3142_v36 = vsel %vm490_vm0, %v3653_v17, 0.0  ;;  %v664_v26 = vand.u32 2147483647, %v4827_v53  ;;  %v666_v61 = vand.u32 2147483648, %v4827_v53  ;;  %v681_v54 = vor.u32 1.1754944e-38, %v680_v28 }
 0x9e0   : > { %v630_v42 = vmul.f32 %v3649_v35, %v629_v15  ;;  %3143 = vadd.xlane.f32.xlu0 %v3142_v36  ;;  %v1494_v44 = vsub.f32 %v4729_v32, %v1487_v3  ;;  %v4886_v15 = vmul.f32 %v4736_v9, %v654_v7 }
 0x9e1   : > { %v667_v9 = vor.u32 1.1754944e-38, %v666_v61  ;;  %vm665_vm8 = vcmp.eq.f32.partialorder %v664_v26, 8.507059e+37 }
 0x9e2   : > { %v631_v0 = vadd.f32 %v3649_v35, %v630_v42  ;;  %v4842_v2 = vpop.eup %3654 }
 0x9e3   : > { %v3657_v27 = vpop.eup %3656  ;;  %v656_v50 = vmul.f32 %v4842_v2, %v4827_v53  ;;  %v1479_v10 = vpop.xlane.xlu2 %1478  ;;  %vm661_vm1 = vweird.f32 %v4842_v2 }
 0x9e4   : > { %v2307_v38 = vpop.xlane.xlu0 %2306  ;;  %v635_v59 = vsel %vm4837_vm9, %v3649_v35, %v631_v0  ;;  %v670_v13 = vmul.f32 %v3657_v27, %v4829_v62  ;;  %3660 = vlog2.f32 %v1479_v10  ;;  %v1485_v34 = vpop.xlane.xlu1 %1484  ;;  %vm675_vm14 = vweird.f32 %v3657_v27  ;;  %vm4892_vm6 = vmor %vm660_vm15, %vm661_vm1 }
 0x9e5   : > { %v640_v45 = vsel %vm637_vm10, %v639_v1, %v635_v59  ;;  %v3659_v55 = vpop.eup %3658  ;;  %v657_v22 = vsub.f32 1.0, %v656_v50  ;;  %3662 = vlog2.f32 %v2307_v38  ;;  %vm4881_vm5 = vmor %vm674_vm13, %vm675_vm14  ;;  %vm1528_vm9 = vcmask 60416  }
 0x9e6   : > { %v4860_v21 = vmul.f32 %v4753_v43, %v640_v45  ;;  %v671_v8 = vsub.f32 1.0, %v670_v13  ;;  %v2320_v47 = vmul.f32 0.6931472, %v3659_v55  ;;  %3664 = vlog2.f32 %v1485_v34 }
 0x9e7   : > { %v658_v32 = vmul.f32 %v4842_v2, %v657_v22  ;;  %v678_v43 = vand.u32 2147483647, %v4829_v62 }
 0x9e8   : > { %v1498_v56 = vmul.f32 %v1494_v44, %v4860_v21  ;;  %v672_v25 = vmul.f32 %v3657_v27, %v671_v8  ;;  %v2326_v48 = vsub.f32 %v4746_v41, %v2320_v47 }
 0x9e9   : > { %v659_v58 = vadd.f32 %v4842_v2, %v658_v32  ;;  %vm679_vm7 = vcmp.eq.f32.partialorder %v678_v43, 8.507059e+37 }
 0x9ea   : > { %v1502_v30 = vsel %vm490_vm0, %v1498_v56, 0.0  ;;  %v3661_v57 = vpop.eup %3660  ;;  %v673_v35 = vadd.f32 %v3657_v27, %v672_v25  ;;  %v2330_v36 = vmul.f32 %v2326_v48, %v4886_v15 }
 0x9eb   : > { %1503 = vadd.xlane.f32.xlu1 %v1502_v30  ;;  %v3663_v14 = vpop.eup %3662  ;;  %v1489_v41 = vmul.f32 0.6931472, %v3661_v57  ;;  %v1482_v16 = vpop.xlane.xlu2 %1481  ;;  %v663_v3 = vsel %vm4892_vm6, %v4842_v2, %v659_v58 }
 0x9ec   : > { %v2313_v63 = vpop.xlane.xlu0 %2312  ;;  %v3665_v17 = vpop.eup %3664  ;;  %v2318_v62 = vmul.f32 0.6931472, %v3663_v14  ;;  %3666 = vlog2.f32 %v1482_v16  ;;  %v677_v1 = vsel %vm4881_vm5, %v3657_v27, %v673_v35  ;;  %v2336_v19 = vsel %vm490_vm0, %v2330_v36, 0.0 }
 0x9ed   : > { %v1495_v49 = vsub.f32 %v4757_v18, %v1489_v41  ;;  %v1493_v42 = vmul.f32 0.6931472, %v3665_v17  ;;  %3668 = vlog2.f32 %v2313_v63  ;;  %v682_v12 = vsel %vm679_vm7, %v681_v54, %v677_v1 }
 0x9ee   : > { %v2325_v31 = vsub.f32 %v4764_v51, %v2318_v62  ;;  %v686_v51 = vmul.f32 %v4778_v24, %v682_v12  ;;  %v668_v50 = vsel %vm665_vm8, %v667_v9, %v663_v3  ;;  %v1518_v62 = vlaneseq }
 0x9ef   : > { %v1499_v53 = vmul.f32 %v1495_v49, %v4886_v15  ;;  %v1497_v0 = vsub.f32 %v4767_v33, %v1493_v42  ;;  %v685_v44 = vmul.f32 %v4775_v40, %v668_v50 }
 0x9f0   : > { %v2329_v18 = vmul.f32 %v2325_v31, %v4860_v21  ;;  %v1519_v9 = vand.u32 127, %v1518_v62 }
 0x9f1   : > { %v1505_v6 = vsel %vm490_vm0, %v1499_v53, 0.0  ;;  %v1501_v13 = vmul.f32 %v1497_v0, %v686_v51 }
 0x9f2   : > { %v3667_v4 = vpop.eup %3666  ;;  %1506 = vadd.xlane.f32.xlu2 %v1505_v6  ;;  %v2333_v27 = vsel %vm490_vm0, %v2329_v18, 0.0 }
 0x9f3   : > { %2337 = vadd.xlane.f32.xlu1 %v2336_v19  ;;  %v3669_v10 = vpop.eup %3668  ;;  %v1491_v38 = vmul.f32 0.6931472, %v3667_v4  ;;  %2334 = vadd.xlane.f32.xlu0 %v2333_v27  ;;  %v2316_v2 = vpop.xlane.xlu2 %2315  ;;  %v1511_v22 = vsel %vm490_vm0, %v1501_v13, 0.0 }
 0x9f4   : > { %v2322_v59 = vmul.f32 0.6931472, %v3669_v10  ;;  %3670 = vlog2.f32 %v2316_v2 }
 0x9f5   : > { %v1496_v33 = vsub.f32 %v4783_v20, %v1491_v38 }
 0x9f6   : > { %v2327_v34 = vsub.f32 %v4790_v46, %v2322_v59 }
 0x9f7   : > { %v1500_v24 = vmul.f32 %v1496_v33, %v685_v44 }
 0x9f8   : > { %v2331_v45 = vmul.f32 %v2327_v34, %v685_v44 }
 0x9f9   : > { %v1508_v55 = vsel %vm490_vm0, %v1500_v24, 0.0 }
 0x9fa   : > { %v3671_v52 = vpop.eup %3670  ;;  %1509 = vadd.xlane.f32.xlu2 %v1508_v55  ;;  %v2339_v8 = vsel %vm490_vm0, %v2331_v45, 0.0 }
 0x9fb   : > { %1512 = vadd.xlane.f32.xlu1 %v1511_v22  ;;  %v2324_v47 = vmul.f32 0.6931472, %v3671_v52  ;;  %2340 = vadd.xlane.f32.xlu0 %v2339_v8 }
 0x9fd   : > { %v2328_v20 = vsub.f32 %v4796_v5, %v2324_v47 }
 0x9ff   : > { %v2332_v32 = vmul.f32 %v2328_v20, %v686_v51 }
 0xa01   : > { %v2342_v40 = vsel %vm490_vm0, %v2332_v32, 0.0 }
 0xa02   : > { %2343 = vadd.xlane.f32.xlu2 %v2342_v40 }
 0xa37   : > { %v3135_v46 = vpop.xlane.xlu0 %3134 }
 0xa38   : > { %3672 = vlog2.f32 %v3135_v46 }
 0xa3e   : > { %v3673_v28 = vpop.eup %3672 }
 0xa3f   : > { %v3146_v56 = vmul.f32 0.6931472, %v3673_v28 }
 0xa41   : > { %v3153_v25 = vsub.f32 %v4806_v39, %v3146_v56 }
 0xa43   : > { %v3157_v43 = vmul.f32 %v3153_v25, %v4860_v21 }
 0xa44   : > { %v3141_v7 = vpop.xlane.xlu2 %3140 }
 0xa45   : > { %v3161_v48 = vsel %vm490_vm0, %v3157_v43, 0.0  ;;  %3674 = vlog2.f32 %v3141_v7 }
 0xa46   : > { %3162 = vadd.xlane.f32.xlu0 %v3161_v48 }
 0xa4b   : > { %v3675_v30 = vpop.eup %3674  ;;  %v3138_v57 = vpop.xlane.xlu1 %3137 }
 0xa4c   : > { %v3150_v5 = vmul.f32 0.6931472, %v3675_v30  ;;  %3676 = vlog2.f32 %v3138_v57 }
 0xa4e   : > { %v3155_v26 = vsub.f32 %v4811_v60, %v3150_v5 }
 0xa50   : > { %v3159_v61 = vmul.f32 %v3155_v26, %v685_v44 }
 0xa52   : > { %v3677_v35 = vpop.eup %3676  ;;  %v3167_v14 = vsel %vm490_vm0, %v3159_v61, 0.0 }
 0xa53   : > { %v3148_v58 = vmul.f32 0.6931472, %v3677_v35  ;;  %3168 = vadd.xlane.f32.xlu2 %v3167_v14  ;;  %v3144_v39 = vpop.xlane.xlu0 %3143 }
 0xa54   : > { %3678 = vlog2.f32 %v3144_v39 }
 0xa55   : > { %v3154_v21 = vsub.f32 %v4815_v23, %v3148_v58 }
 0xa57   : > { %v3158_v37 = vmul.f32 %v3154_v21, %v4886_v15 }
 0xa59   : > { %v3164_v54 = vsel %vm490_vm0, %v3158_v37, 0.0 }
 0xa5a   : > { %v3679_v41 = vpop.eup %3678  ;;  %3165 = vadd.xlane.f32.xlu1 %v3164_v54 }
 0xa5b   : > { %v3152_v16 = vmul.f32 0.6931472, %v3679_v41 }
 0xa5d   : > { %v3156_v63 = vsub.f32 %v4822_v11, %v3152_v16 }
 0xa5e   : > { %v1504_v60 = vpop.xlane.xlu1 %1503 }
 0xa5f   : > { %v3160_v17 = vmul.f32 %v3156_v63, %v686_v51  ;;  %v1520_v31 = vperm.slane %v1504_v60, %v1519_v9 }
 0xa61   : > { %v3170_v29 = vsel %vm490_vm0, %v3160_v17, 0.0 }
 0xa62   : > { %3171 = vadd.xlane.f32.xlu0 %v3170_v29 }
 0xa65   : > { %v1507_v49 = vpop.xlane.xlu2 %1506 }
 0xa66   : > { %v2338_v42 = vpop.xlane.xlu1 %2337  ;;  %v2335_v36 = vpop.xlane.xlu0 %2334  ;;  %v1521_v23 = vperm.slane %v1507_v49, %v1519_v9 }
 0xa67   : > { %v2350_v6 = vperm.slane %v2338_v42, %v1519_v9  ;;  %v2349_v19 = vperm.slane %v2335_v36, %v1519_v9 }
 0xa68   : > { %v1524_v12 = vsel %vm1270_vm2, %v1521_v23, %v1520_v31 }
 0xa69   : > { %v2353_v50 = vsel %vm1270_vm2, %v2350_v6, %v2349_v19 }
 0xa6d   : > { %v1510_v15 = vpop.xlane.xlu2 %1509 }
 0xa6e   : > { %v1513_v1 = vpop.xlane.xlu1 %1512  ;;  %v1522_v53 = vperm.slane %v1510_v15, %v1519_v9  ;;  %v2341_v11 = vpop.xlane.xlu0 %2340 }
 0xa6f   : > { %v1523_v3 = vperm.slane %v1513_v1, %v1519_v9  ;;  %v2351_v4 = vperm.slane %v2341_v11, %v1519_v9 }
 0xa70   : > { %v1525_v18 = vsel %vm1272_vm3, %v1522_v53, %v1524_v12 }
 0xa71   : > { %v1526_v0 = vsel %vm1274_vm4, %v1523_v3, %v1525_v18  ;;  %v2354_v38 = vsel %vm1272_vm3, %v2351_v4, %v2353_v50 }
 0xa72   : > { %v1529_v51 = vsel %vm1528_vm9, %v1526_v0, 0.0 }
 0xa73   : > { %1530 = vadd.xlane.f32.xlu1 %v1529_v51 }
 0xa75   : > { %v2344_v27 = vpop.xlane.xlu2 %2343 }
 0xa76   : > { %v2352_v10 = vperm.slane %v2344_v27, %v1519_v9 }
 0xa78   : > { %v2355_v2 = vsel %vm1274_vm4, %v2352_v10, %v2354_v38 }
 0xa79   : > { %v2357_v59 = vsel %vm1528_vm9, %v2355_v2, 0.0 }
 0xa7a   : > { %2358 = vadd.xlane.f32.xlu2 %v2357_v59 }
 0xab9   : > { %v3163_v33 = vpop.xlane.xlu0 %3162 }
 0xaba   : > { %v3177_v34 = vperm.slane %v3163_v33, %v1519_v9 }
 0xac6   : > { %v3169_v24 = vpop.xlane.xlu2 %3168 }
 0xac7   : > { %v3179_v55 = vperm.slane %v3169_v24, %v1519_v9 }
 0xacd   : > { %v3166_v44 = vpop.xlane.xlu1 %3165 }
 0xace   : > { %v3178_v13 = vperm.slane %v3166_v44, %v1519_v9 }
 0xad0   : > { %v3181_v45 = vsel %vm1270_vm2, %v3178_v13, %v3177_v34 }
 0xad1   : > { %v3182_v8 = vsel %vm1272_vm3, %v3179_v55, %v3181_v45 }
 0xad5   : > { %v3172_v22 = vpop.xlane.xlu0 %3171 }
 0xad6   : > { %v3180_v52 = vperm.slane %v3172_v22, %v1519_v9 }
 0xad8   : > { %v3183_v47 = vsel %vm1274_vm4, %v3180_v52, %v3182_v8 }
 0xad9   : > { %v3185_v20 = vsel %vm1528_vm9, %v3183_v47, 0.0 }
 0xada   : > { %3186 = vadd.xlane.f32.xlu0 %v3185_v20 }
 0xadb   : > { %3889 = shalt.err (!%p3886_p9)
}
 0xadc   : > { %s3951_s8 = smov 128   ;;  %s3952_s24 = smov 8   ;;  %vm3207_vm0 = vcmask 0  }
 0xadd   : > { %3482 = dma.vmem_to_hbm [thread:$0]  (%p4061_p11), %s3234_s6, 512, %s3236_s14, %s3217_s30, %s3951_s8, %s3951_s8, %s3952_s24  }
 0xade   : > { %s3447_s26 = sld [smem:[#allocation4 + $0x1]]  ;;  %s3429_s9 = sshll.u32 %s4030_s19, 2 }
 0xadf   : > { %s1534_s17 = sld [smem:[#allocation4]]  ;;  %p465_p10 = scmp.lt.s32.totalorder %s3429_s9, 7 }
 0xae0   : > { %s3457_s3 = sld [smem:[#allocation4 + $0x2]] }
 0xae1   : > { %s5056_s9 = smov (!%p465_p10, %s3429_s9), 7  ;;  %s5046_s28 = sld [smem:[#allocation29_spill]] }
 0xae4   : > { %v2363_v25 = vstv %s3447_s26 }
 0xae5   : > { %v1535_v7 = vstv %s1534_s17 }
 0xae6   : > { %v1531_v40 = vpop.xlane.xlu1 %1530  ;;  %v3191_v5 = vstv %s3457_s3 }
 0xae7   : > { %v1532_v28 = vsub.f32 0.0, %v1531_v40  ;;  %s467_s6 = scalar_lea.vmem %s5046_s28, %s5056_s9 }
 0xae9   : > { %v1533_v43 = vmul.f32 0.125, %v1532_v28 }
 0xaeb   : > { %v1536_v26 = vmul.f32 %v1535_v7, %v1533_v43 }
 0xaed   : > { %v2359_v32 = vpop.xlane.xlu2 %2358 }
 0xaee   : > { %v2360_v46 = vsub.f32 0.0, %v2359_v32 }
 0xaf0   : > { %v2361_v56 = vmul.f32 0.125, %v2360_v46 }
 0xaf2   : > { %v2364_v30 = vmul.f32 %v2363_v25, %v2361_v56 }
 0xaf4   : > { %v2365_v35 = vadd.f32 %v2364_v30, %v1536_v26 }
 0xb4d   : > { %v3187_v48 = vpop.xlane.xlu0 %3186 }
 0xb4e   : > { %v3188_v57 = vsub.f32 0.0, %v3187_v48 }
 0xb50   : > { %v3189_v61 = vmul.f32 0.125, %v3188_v57 }
 0xb52   : > { %v3192_v14 = vmul.f32 %v3191_v5, %v3189_v61 }
 0xb54   : > { %v3193_v58 = vadd.f32 %v3192_v14, %v2365_v35 }
 0xb56   : > { %v3199_v39 = vperm.slane %v3193_v58, 0  ;;  %v3200_v21 = vperm.slane %v3193_v58, 1  ;;  %v3201_v37 = vperm.slane %v3193_v58, 2  ;;  %v3202_v54 = vperm.slane %v3193_v58, 3 }
 0xb58   : > { %3208 = vst.msk [vmem:[%s467_s6] sm:$0x1] %vm3207_vm0, %v3199_v39 }
 0xb59   : > { %3209 = vst.msk [vmem:[%s467_s6 + $0x1] sm:$0x1] %vm3207_vm0, %v3200_v21 }
 0xb5a   : > { %3210 = vst.msk [vmem:[%s467_s6 + $0x2] sm:$0x1] %vm3207_vm0, %v3201_v37 }
 0xb5b   : > { %3211 = vst.msk [vmem:[%s467_s6 + $0x3] sm:$0x1] %vm3207_vm0, %v3202_v54 }
 0xb5c PF: > { %s5047_s19 = sld [smem:[#allocation21_spill]]  ;;  %p5049_p11 = scmp.ge.s32.totalorder %s3942_s18, 2 }
 0xb5e   : > { %p3502_p1 = pnand %p5049_p11, %p4065_p12 }
 0xb60   : > { %p3503_p2 = pneg %p3502_p1 }
 0xb62   : > { %s3257_s23 = sand.u32 1, %s5047_s19  }
 0xb63   : > { %s3258_s20 = scalar_lea.sflag [#allocation7], %s3257_s23 }
 0xb64   : > { %3925 = dma.done.wait (%p3503_p2), %s3258_s20, 512  }
 0xb65   : > { %3927 = vsyncadd (%p3503_p2), %s3258_s20, 4294966784  ;;  %s5050_s18 = sld [smem:[#allocation23_spill]]  ;;  %s5053_s0 = smov %s3934_s1 }
 0xb66   : > { %s5051_s25 = sld [smem:[#allocation22_spill]] }
 0xb67   : > { %s5052_s17 = sld [smem:[#allocation24_spill]] }
 0xb6b   : > { %p42_p4 = scmp.ge.s32.totalorder %s5050_s18, 4  }
 0xb6c   : > { %s5054_s1 = smov %s5051_s25 }
 0xb6d   :  { %44 = sbr.rel (!%p42_p4) target bundleno = 19 (0x13), region = 142 }
 0xb72   :  { %3264 = vsyncpa [#allocation6], 1 }
 0xb73   :  { %3266 = vsyncpa [#allocation6 + $0x1], 1 }
 0xb74   :  { %3267 = vsyncpa [#allocation9], 1 }
 0xb75   :  { %3269 = vsyncpa [#allocation9 + $0x1], 1 }
 0xb76   :  { %3270 = vsyncpa [#allocation12], 1 }
 0xb77   :  { %3272 = vsyncpa [#allocation12 + $0x1], 1 }
 0xb78   :  { %3273 = vsyncpa [#allocation7], 1 }
 0xb79   :  { %3275 = vsyncpa [#allocation7 + $0x1], 1 }

</bundles_post_ra>
